<compile_context>
chip_gen: v6e
topology: v6e:2x2x1
jax: 0.10.0
libtpu: 0.0.40
codegen_flags: <defaults>
</compile_context>

<pallas_src>
import jax
import jax.numpy as jnp
from jax.experimental import pallas as pl
from jax.experimental.pallas import tpu as pltpu

LN_EPS = 1e-5

# ---- row indices inside the packed parameter-vector arrays ------------------------
# vec_h  rows (width = hidden)
S_B2, S_G2, S_BE2, S_B3 = 0, 1, 2, 3
T_B2, T_G2, T_BE2, T_B3 = 4, 5, 6, 7
F_B, F_G, F_BE, F_CS = 8, 9, 10, 11          # fusion bias / ln gamma / ln beta / colsum(W_mask)
D_B1, D_G1, D_BE1 = 12, 13, 14
N_VEC_H = 15
# vec_h2 rows (width = 2 * hidden)
S_B1, S_G1, S_BE1 = 0, 1, 2
T_B1, T_G1, T_BE1 = 3, 4, 5
D_B2, D_G2, D_BE2 = 6, 7, 8
N_VEC_H2 = 9
# vec_g  rows (width = num_genes)
M_B, D_B3 = 0, 1
N_VEC_G = 2


# ---------------- in-kernel building blocks ----------------------------------------

def _mish(x):
    # mish(x) = x * tanh(softplus(x)) = x * e^x (e^x + 2) / (e^x (e^x + 2) + 2)
    # Clamp mirrors PyTorch's softplus overflow guard (ratio -> 1, mish -> x).
    # approx reciprocal (EUP slot) deviates by a few ulps from the torch reference.
    t = jnp.exp(jnp.minimum(x, 20.0))
    u = t * (t + 2.0)
    return x * u * pl.reciprocal(u + 2.0, approx=True)


def _ln_mish(y, gamma, beta):
    # PyTorch-style LayerNorm (biased variance, eps inside sqrt), centered two-pass stats.
    mean = jnp.mean(y, axis=-1, keepdims=True)
    yc = y - mean
    var = jnp.mean(yc * yc, axis=-1, keepdims=True)
    yn = yc * jax.lax.rsqrt(var + LN_EPS)
    return _mish(yn * gamma + beta)


def _dense(h_bf16, w_bf16, b_f32):
    # bf16 x bf16 -> f32 accumulation on the MXU, f32 bias add.
    return jnp.dot(h_bf16, w_bf16, preferred_element_type=jnp.float32) + b_f32


def _encode(x_bf, w1, w2, w3, b1, g1, be1, b2, g2, be2, b3):
    # Linear -> LN -> Mish -> (Dropout p=0) -> Linear -> LN -> Mish -> (Dropout p=0) -> Linear
    h = _ln_mish(_dense(x_bf, w1, b1), g1, be1).astype(jnp.bfloat16)
    h = _ln_mish(_dense(h, w2, b2), g2, be2).astype(jnp.bfloat16)
    return _dense(h, w3, b3)  # f32


# ---------------- single fused forward kernel ---------------------------------------

def _autoencoder_kernel(x_ref, cx_ref,
                        enc_w1, enc_w2, enc_w3,            # stacked [S; T] encoder weights
                        m_w, f_wl, f_wm,
                        d_w1, d_w2, d_w3,
                        vh, vh2, vg,                       # packed f32 bias/LN vectors
                        rec_ref, mask_ref, lat_s_ref, lat_t_ref,
                        lat2_scr):
    TB = x_ref.shape[0]

    def row_h(i):  return vh[i:i + 1, :]
    def row_h2(i): return vh2[i:i + 1, :]
    def row_g(i):  return vg[i:i + 1, :]

    # encoderS / encoderT — activations stay in vregs/VMEM
    lat_s0 = _encode(x_ref[...], enc_w1[0], enc_w2[0], enc_w3[0],
                     row_h2(S_B1), row_h2(S_G1), row_h2(S_BE1),
                     row_h(S_B2), row_h(S_G2), row_h(S_BE2), row_h(S_B3))
    lat_t0 = _encode(cx_ref[...], enc_w1[1], enc_w2[1], enc_w3[1],
                     row_h2(T_B1), row_h2(T_G1), row_h2(T_BE1),
                     row_h(T_B2), row_h(T_G2), row_h(T_BE2), row_h(T_B3))

    # mask predictor
    mask_pred = _dense(lat_s0.astype(jnp.bfloat16), m_w[...], row_g(M_B))
    mask_ref[...] = mask_pred

    # fusion: torch.cat([latent, mask], 1) @ W  ==  latent @ W_lat + mask @ W_mask.
    # Teacher path uses (1 - mask): folded as colsum(W_mask) - mask @ W_mask, so the
    # G-wide matmul runs once (B rows) and no (2B, G) concat is ever materialized.
    mp_proj = jnp.dot(mask_pred.astype(jnp.bfloat16), f_wm[...],
                      preferred_element_type=jnp.float32)           # (TB, H)
    lat2_scr[0:TB, :] = lat_s0
    lat2_scr[TB:2 * TB, :] = lat_t0
    zz = jnp.dot(lat2_scr[...].astype(jnp.bfloat16), f_wl[...],
                 preferred_element_type=jnp.float32) + row_h(F_B)   # (2TB, H)
    z_s = zz[0:TB] + mp_proj
    z_t = zz[TB:2 * TB] + (row_h(F_CS) - mp_proj)
    gamma_f, beta_f = row_h(F_G), row_h(F_BE)
    fused_s = _ln_mish(z_s, gamma_f, beta_f)
    fused_t = _ln_mish(z_t, gamma_f, beta_f)
    lat_s_ref[...] = fused_s
    lat_t_ref[...] = fused_t

    # decoder
    h = _ln_mish(_dense(fused_s.astype(jnp.bfloat16), d_w1[...], row_h(D_B1)),
                 row_h(D_G1), row_h(D_BE1)).astype(jnp.bfloat16)
    h = _ln_mish(_dense(h, d_w2[...], row_h2(D_B2)),
                 row_h2(D_G2), row_h2(D_BE2)).astype(jnp.bfloat16)
    rec_ref[...] = _dense(h, d_w3[...], row_g(D_B3))


# ---------------- parameter construction (deterministic, synthetic) -----------------

def _make_linear(key, fan_in, fan_out):
    kw, kb = jax.random.split(key)
    scale = 1.0 / jnp.sqrt(fan_in)
    w = jax.random.uniform(kw, (fan_in, fan_out), jnp.float32, -scale, scale)
    b = jax.random.uniform(kb, (fan_out,), jnp.float32, -scale, scale)
    return {"w": w.astype(jnp.bfloat16), "b": b}


def _make_ln(dim):
    return {"gamma": jnp.ones((dim,), jnp.float32),
            "beta": jnp.zeros((dim,), jnp.float32)}


def make_params(key, num_genes, hidden):
    keys = jax.random.split(key, 12)

    def enc(k1, k2, k3, d_in):
        return {"l1": _make_linear(k1, d_in, hidden * 2), "ln1": _make_ln(hidden * 2),
                "l2": _make_linear(k2, hidden * 2, hidden), "ln2": _make_ln(hidden),
                "l3": _make_linear(k3, hidden, hidden)}

    p = {}
    p["encS"] = enc(keys[0], keys[1], keys[2], num_genes)
    p["encT"] = enc(keys[3], keys[4], keys[5], num_genes)   # frozen teacher (inference)
    p["maskPredictor"] = _make_linear(keys[6], hidden, num_genes)
    p["fusion"] = {"linear": _make_linear(keys[7], hidden + num_genes, hidden),
                   "ln": _make_ln(hidden)}
    p["decoder"] = {
        "l1": _make_linear(keys[8], hidden, hidden), "ln1": _make_ln(hidden),
        "l2": _make_linear(keys[9], hidden, hidden * 2), "ln2": _make_ln(hidden * 2),
        "l3": _make_linear(keys[10], hidden * 2, num_genes),
    }
    return p


def pack_params(p):
    """One-time packing: stack S/T encoder weights, split + colsum the fusion weight,
    and pack every small bias / LN vector into three f32 arrays (grouped by width)."""
    H = p["encS"]["l3"]["w"].shape[0]
    encS, encT, dec, fus = p["encS"], p["encT"], p["decoder"], p["fusion"]
    f_w = fus["linear"]["w"]                       # (H + G, H) bf16
    f_wl, f_wm = f_w[:H], f_w[H:]
    colsum_wm = jnp.sum(f_wm.astype(jnp.float32), axis=0)   # ones(G) @ W_mask, f32

    vec_h = jnp.stack([
        encS["l2"]["b"], encS["ln2"]["gamma"], encS["ln2"]["beta"], encS["l3"]["b"],
        encT["l2"]["b"], encT["ln2"]["gamma"], encT["ln2"]["beta"], encT["l3"]["b"],
        fus["linear"]["b"], fus["ln"]["gamma"], fus["ln"]["beta"], colsum_wm,
        dec["l1"]["b"], dec["ln1"]["gamma"], dec["ln1"]["beta"],
    ]).astype(jnp.float32)
    vec_h2 = jnp.stack([
        encS["l1"]["b"], encS["ln1"]["gamma"], encS["ln1"]["beta"],
        encT["l1"]["b"], encT["ln1"]["gamma"], encT["ln1"]["beta"],
        dec["l2"]["b"], dec["ln2"]["gamma"], dec["ln2"]["beta"],
    ]).astype(jnp.float32)
    vec_g = jnp.stack([p["maskPredictor"]["b"], dec["l3"]["b"]]).astype(jnp.float32)

    return {
        "enc_w1": jnp.stack([encS["l1"]["w"], encT["l1"]["w"]]),   # (2, G, 2H) bf16
        "enc_w2": jnp.stack([encS["l2"]["w"], encT["l2"]["w"]]),   # (2, 2H, H)
        "enc_w3": jnp.stack([encS["l3"]["w"], encT["l3"]["w"]]),   # (2, H, H)
        "m_w": p["maskPredictor"]["w"],                            # (H, G)
        "f_wl": f_wl, "f_wm": f_wm,                                # (H, H), (G, H)
        "d_w1": dec["l1"]["w"], "d_w2": dec["l2"]["w"], "d_w3": dec["l3"]["w"],
        "vec_h": vec_h, "vec_h2": vec_h2, "vec_g": vec_g,
    }


# ---------------- forward pass: one fused pallas_call --------------------------------

@jax.jit
def autoencoder_forward(packed, x, comp_x):
    B, G = x.shape
    H = packed["f_wl"].shape[0]
    H2 = 2 * H

    TB = B if B <= 128 else 128          # batch tile (rows per grid step)
    assert B % TB == 0
    nb = B // TB

    x_bf = x.astype(jnp.bfloat16)        # halve input DMA bytes; MXU is bf16 anyway
    cx_bf = comp_x.astype(jnp.bfloat16)

    batch_spec = lambda shape: pl.BlockSpec(shape, lambda i: (i, 0))
    const2 = lambda shape: pl.BlockSpec(shape, lambda i: (0, 0))
    const3 = lambda shape: pl.BlockSpec(shape, lambda i: (0, 0, 0))

    rec, mask_pred, lat_s, lat_t = pl.pallas_call(
        _autoencoder_kernel,
        out_shape=(jax.ShapeDtypeStruct((B, G), jnp.float32),   # reconstruction
                   jax.ShapeDtypeStruct((B, G), jnp.float32),   # mask_pred (logits)
                   jax.ShapeDtypeStruct((B, H), jnp.float32),   # latent_S
                   jax.ShapeDtypeStruct((B, H), jnp.float32)),  # latent_T
        grid_spec=pltpu.PrefetchScalarGridSpec(
            num_scalar_prefetch=0,
            grid=(nb,),
            in_specs=[
                batch_spec((TB, G)),            # x
                batch_spec((TB, G)),            # comp_x
                const3((2, G, H2)),             # enc_w1 (S,T)
                const3((2, H2, H)),             # enc_w2
                const3((2, H, H)),              # enc_w3
                const2((H, G)),                 # maskPredictor W
                const2((H, H)),                 # fusion W_lat
                const2((G, H)),                 # fusion W_mask
                const2((H, H)),                 # dec l1 W
                const2((H, H2)),                # dec l2 W
                const2((H2, G)),                # dec l3 W
                const2((N_VEC_H, H)),           # packed H-wide vectors
                const2((N_VEC_H2, H2)),         # packed 2H-wide vectors
                const2((N_VEC_G, G)),           # packed G-wide vectors
            ],
            out_specs=(batch_spec((TB, G)), batch_spec((TB, G)),
                       batch_spec((TB, H)), batch_spec((TB, H))),
            scratch_shapes=[pltpu.VMEM((2 * TB, H), jnp.float32)],
        ),
        compiler_params=pltpu.CompilerParams(
            dimension_semantics=("parallel",),
            vmem_limit_bytes=64 * 1024 * 1024),
    )(x_bf, cx_bf,
      packed["enc_w1"], packed["enc_w2"], packed["enc_w3"],
      packed["m_w"], packed["f_wl"], packed["f_wm"],
      packed["d_w1"], packed["d_w2"], packed["d_w3"],
      packed["vec_h"], packed["vec_h2"], packed["vec_g"])

    return {"reconstruction": rec,
            "mask_pred": mask_pred,
            "latent_S": lat_s,
            "latent_T": lat_t}


if __name__ == "__main__":
    NUM_GENES = 256
    HIDDEN = 128
    BATCH = 8

    key = jax.random.PRNGKey(0)
    kp, kx, kc = jax.random.split(key, 3)
    params = make_params(kp, NUM_GENES, HIDDEN)
    packed = pack_params(params)
    x = jax.random.normal(kx, (BATCH, NUM_GENES), jnp.float32)
    comp_x = jax.random.normal(kc, (BATCH, NUM_GENES), jnp.float32)

    out = autoencoder_forward(packed, x, comp_x)
    jax.block_until_ready(out)

    assert out["reconstruction"].shape == (BATCH, NUM_GENES)
    assert out["mask_pred"].shape == (BATCH, NUM_GENES)
    assert out["latent_S"].shape == (BATCH, HIDDEN)
    assert out["latent_T"].shape == (BATCH, HIDDEN)
    print("KERNEL_OK")
</pallas_src>

<mosaic_0001>
module attributes {stable_mosaic.version = 11 : i64} {
  func.func @_autoencoder_kernel(%arg0: i32, %arg1: memref<8x256xbf16, #tpu.memory_space<vmem>>, %arg2: memref<8x256xbf16, #tpu.memory_space<vmem>>, %arg3: memref<2x256x256xbf16, #tpu.memory_space<vmem>>, %arg4: memref<2x256x128xbf16, #tpu.memory_space<vmem>>, %arg5: memref<2x128x128xbf16, #tpu.memory_space<vmem>>, %arg6: memref<128x256xbf16, #tpu.memory_space<vmem>>, %arg7: memref<128x128xbf16, #tpu.memory_space<vmem>>, %arg8: memref<256x128xbf16, #tpu.memory_space<vmem>>, %arg9: memref<128x128xbf16, #tpu.memory_space<vmem>>, %arg10: memref<128x256xbf16, #tpu.memory_space<vmem>>, %arg11: memref<256x256xbf16, #tpu.memory_space<vmem>>, %arg12: memref<15x128xf32, #tpu.memory_space<vmem>>, %arg13: memref<9x256xf32, #tpu.memory_space<vmem>>, %arg14: memref<2x256xf32, #tpu.memory_space<vmem>>, %arg15: memref<8x256xf32, #tpu.memory_space<vmem>>, %arg16: memref<8x256xf32, #tpu.memory_space<vmem>>, %arg17: memref<8x128xf32, #tpu.memory_space<vmem>>, %arg18: memref<8x128xf32, #tpu.memory_space<vmem>>, %arg19: memref<16x128xf32, #tpu.memory_space<vmem>>) attributes {dimension_semantics = [#tpu.dimension_semantics<parallel>], iteration_bounds = array<i64: 1>, scalar_prefetch = 0 : i64, scratch_operands = 1 : i64, tpu.core_type = #tpu.core_type<tc>, window_params = [{transform_indices = @transform_0, window_bounds = array<i64: 8, 256>}, {transform_indices = @transform_1, window_bounds = array<i64: 8, 256>}, {pipeline_mode = #tpu.pipeline_mode<synchronous>, transform_indices = @transform_2, window_bounds = array<i64: 2, 256, 256>}, {pipeline_mode = #tpu.pipeline_mode<synchronous>, transform_indices = @transform_3, window_bounds = array<i64: 2, 256, 128>}, {pipeline_mode = #tpu.pipeline_mode<synchronous>, transform_indices = @transform_4, window_bounds = array<i64: 2, 128, 128>}, {pipeline_mode = #tpu.pipeline_mode<synchronous>, transform_indices = @transform_5, window_bounds = array<i64: 128, 256>}, {pipeline_mode = #tpu.pipeline_mode<synchronous>, transform_indices = @transform_6, window_bounds = array<i64: 128, 128>}, {pipeline_mode = #tpu.pipeline_mode<synchronous>, transform_indices = @transform_7, window_bounds = array<i64: 256, 128>}, {pipeline_mode = #tpu.pipeline_mode<synchronous>, transform_indices = @transform_8, window_bounds = array<i64: 128, 128>}, {pipeline_mode = #tpu.pipeline_mode<synchronous>, transform_indices = @transform_9, window_bounds = array<i64: 128, 256>}, {pipeline_mode = #tpu.pipeline_mode<synchronous>, transform_indices = @transform_10, window_bounds = array<i64: 256, 256>}, {pipeline_mode = #tpu.pipeline_mode<synchronous>, transform_indices = @transform_11, window_bounds = array<i64: 15, 128>}, {pipeline_mode = #tpu.pipeline_mode<synchronous>, transform_indices = @transform_12, window_bounds = array<i64: 9, 256>}, {pipeline_mode = #tpu.pipeline_mode<synchronous>, transform_indices = @transform_13, window_bounds = array<i64: 2, 256>}, {transform_indices = @transform_14, window_bounds = array<i64: 8, 256>}, {transform_indices = @transform_15, window_bounds = array<i64: 8, 256>}, {transform_indices = @transform_16, window_bounds = array<i64: 8, 128>}, {transform_indices = @transform_17, window_bounds = array<i64: 8, 128>}]} {
    %c0 = arith.constant 0 : index
    %c0_0 = arith.constant 0 : index
    %0 = vector.load %arg1[%c0, %c0_0] : memref<8x256xbf16, #tpu.memory_space<vmem>>, vector<8x256xbf16>
    %c0_1 = arith.constant 0 : index
    %c0_2 = arith.constant 0 : index
    %c0_3 = arith.constant 0 : index
    %1 = vector.load %arg3[%c0_1, %c0_2, %c0_3] : memref<2x256x256xbf16, #tpu.memory_space<vmem>>, vector<1x256x256xbf16>
    %2 = vector.shape_cast %1 : vector<1x256x256xbf16> to vector<256x256xbf16>
    %c0_4 = arith.constant 0 : index
    %c0_5 = arith.constant 0 : index
    %c0_6 = arith.constant 0 : index
    %3 = vector.load %arg4[%c0_4, %c0_5, %c0_6] : memref<2x256x128xbf16, #tpu.memory_space<vmem>>, vector<1x256x128xbf16>
    %4 = vector.shape_cast %3 : vector<1x256x128xbf16> to vector<256x128xbf16>
    %c0_7 = arith.constant 0 : index
    %c0_8 = arith.constant 0 : index
    %c0_9 = arith.constant 0 : index
    %5 = vector.load %arg5[%c0_7, %c0_8, %c0_9] : memref<2x128x128xbf16, #tpu.memory_space<vmem>>, vector<1x128x128xbf16>
    %6 = vector.shape_cast %5 : vector<1x128x128xbf16> to vector<128x128xbf16>
    %c0_10 = arith.constant 0 : index
    %c0_11 = arith.constant 0 : index
    %7 = vector.load %arg13[%c0_10, %c0_11] : memref<9x256xf32, #tpu.memory_space<vmem>>, vector<1x256xf32>
    %c1 = arith.constant 1 : index
    %c0_12 = arith.constant 0 : index
    %8 = vector.load %arg13[%c1, %c0_12] : memref<9x256xf32, #tpu.memory_space<vmem>>, vector<1x256xf32>
    %c2 = arith.constant 2 : index
    %c0_13 = arith.constant 0 : index
    %9 = vector.load %arg13[%c2, %c0_13] : memref<9x256xf32, #tpu.memory_space<vmem>>, vector<1x256xf32>
    %c0_14 = arith.constant 0 : index
    %c0_15 = arith.constant 0 : index
    %10 = vector.load %arg12[%c0_14, %c0_15] : memref<15x128xf32, #tpu.memory_space<vmem>>, vector<1x128xf32>
    %c1_16 = arith.constant 1 : index
    %c0_17 = arith.constant 0 : index
    %11 = vector.load %arg12[%c1_16, %c0_17] : memref<15x128xf32, #tpu.memory_space<vmem>>, vector<1x128xf32>
    %c2_18 = arith.constant 2 : index
    %c0_19 = arith.constant 0 : index
    %12 = vector.load %arg12[%c2_18, %c0_19] : memref<15x128xf32, #tpu.memory_space<vmem>>, vector<1x128xf32>
    %c3 = arith.constant 3 : index
    %c0_20 = arith.constant 0 : index
    %13 = vector.load %arg12[%c3, %c0_20] : memref<15x128xf32, #tpu.memory_space<vmem>>, vector<1x128xf32>
    %cst = arith.constant dense<0.000000e+00> : vector<8x256xf32>
    %14 = tpu.matmul %0, %2, %cst {dimension_numbers = #tpu.dot_dimension_numbers<[1], [0], [0], [1], [0, 0, 1, 1], [], []>} : vector<8x256xbf16>, vector<256x256xbf16>, vector<8x256xf32> -> vector<8x256xf32>
    %15 = vector.broadcast %7 : vector<1x256xf32> to vector<8x256xf32>
    %16 = arith.addf %14, %15 : vector<8x256xf32>
    %cst_21 = arith.constant dense<0.000000e+00> : vector<8xf32>
    %17 = vector.multi_reduction <add>, %16, %cst_21 [1] : vector<8x256xf32> to vector<8xf32>
    %18 = vector.shape_cast %17 : vector<8xf32> to vector<8x1xf32>
    %cst_22 = arith.constant 2.560000e+02 : f32
    %19 = vector.broadcast %cst_22 : f32 to vector<8x1xf32>
    %20 = arith.divf %18, %19 : vector<8x1xf32>
    %21 = vector.broadcast %20 : vector<8x1xf32> to vector<8x256xf32>
    %22 = arith.subf %16, %21 : vector<8x256xf32>
    %23 = arith.mulf %22, %22 : vector<8x256xf32>
    %cst_23 = arith.constant dense<0.000000e+00> : vector<8xf32>
    %24 = vector.multi_reduction <add>, %23, %cst_23 [1] : vector<8x256xf32> to vector<8xf32>
    %25 = vector.shape_cast %24 : vector<8xf32> to vector<8x1xf32>
    %cst_24 = arith.constant 2.560000e+02 : f32
    %26 = vector.broadcast %cst_24 : f32 to vector<8x1xf32>
    %27 = arith.divf %25, %26 : vector<8x1xf32>
    %cst_25 = arith.constant 9.99999974E-6 : f32
    %28 = vector.broadcast %cst_25 : f32 to vector<8x1xf32>
    %29 = arith.addf %27, %28 : vector<8x1xf32>
    %30 = math.rsqrt %29 : vector<8x1xf32>
    %31 = vector.broadcast %30 : vector<8x1xf32> to vector<8x256xf32>
    %32 = arith.mulf %22, %31 : vector<8x256xf32>
    %33 = vector.broadcast %8 : vector<1x256xf32> to vector<8x256xf32>
    %34 = arith.mulf %32, %33 : vector<8x256xf32>
    %35 = vector.broadcast %9 : vector<1x256xf32> to vector<8x256xf32>
    %36 = arith.addf %34, %35 : vector<8x256xf32>
    %cst_26 = arith.constant 2.000000e+01 : f32
    %37 = vector.broadcast %cst_26 : f32 to vector<8x256xf32>
    %38 = arith.minimumf %36, %37 : vector<8x256xf32>
    %39 = math.exp %38 : vector<8x256xf32>
    %cst_27 = arith.constant 2.000000e+00 : f32
    %40 = vector.broadcast %cst_27 : f32 to vector<8x256xf32>
    %41 = arith.addf %39, %40 : vector<8x256xf32>
    %42 = arith.mulf %39, %41 : vector<8x256xf32>
    %43 = arith.mulf %36, %42 : vector<8x256xf32>
    %cst_28 = arith.constant 2.000000e+00 : f32
    %44 = vector.broadcast %cst_28 : f32 to vector<8x256xf32>
    %45 = arith.addf %42, %44 : vector<8x256xf32>
    %46 = tpu.reciprocal %45 {approx = true} : vector<8x256xf32> -> vector<8x256xf32>
    %47 = arith.mulf %43, %46 : vector<8x256xf32>
    %48 = arith.truncf %47 : vector<8x256xf32> to vector<8x256xbf16>
    %cst_29 = arith.constant dense<0.000000e+00> : vector<8x128xf32>
    %49 = tpu.matmul %48, %4, %cst_29 {dimension_numbers = #tpu.dot_dimension_numbers<[1], [0], [0], [1], [0, 0, 1, 1], [], []>} : vector<8x256xbf16>, vector<256x128xbf16>, vector<8x128xf32> -> vector<8x128xf32>
    %50 = vector.broadcast %10 : vector<1x128xf32> to vector<8x128xf32>
    %51 = arith.addf %49, %50 : vector<8x128xf32>
    %cst_30 = arith.constant dense<0.000000e+00> : vector<8xf32>
    %52 = vector.multi_reduction <add>, %51, %cst_30 [1] : vector<8x128xf32> to vector<8xf32>
    %53 = vector.shape_cast %52 : vector<8xf32> to vector<8x1xf32>
    %cst_31 = arith.constant 1.280000e+02 : f32
    %54 = vector.broadcast %cst_31 : f32 to vector<8x1xf32>
    %55 = arith.divf %53, %54 : vector<8x1xf32>
    %56 = vector.broadcast %55 : vector<8x1xf32> to vector<8x128xf32>
    %57 = arith.subf %51, %56 : vector<8x128xf32>
    %58 = arith.mulf %57, %57 : vector<8x128xf32>
    %cst_32 = arith.constant dense<0.000000e+00> : vector<8xf32>
    %59 = vector.multi_reduction <add>, %58, %cst_32 [1] : vector<8x128xf32> to vector<8xf32>
    %60 = vector.shape_cast %59 : vector<8xf32> to vector<8x1xf32>
    %cst_33 = arith.constant 1.280000e+02 : f32
    %61 = vector.broadcast %cst_33 : f32 to vector<8x1xf32>
    %62 = arith.divf %60, %61 : vector<8x1xf32>
    %cst_34 = arith.constant 9.99999974E-6 : f32
    %63 = vector.broadcast %cst_34 : f32 to vector<8x1xf32>
    %64 = arith.addf %62, %63 : vector<8x1xf32>
    %65 = math.rsqrt %64 : vector<8x1xf32>
    %66 = vector.broadcast %65 : vector<8x1xf32> to vector<8x128xf32>
    %67 = arith.mulf %57, %66 : vector<8x128xf32>
    %68 = vector.broadcast %11 : vector<1x128xf32> to vector<8x128xf32>
    %69 = arith.mulf %67, %68 : vector<8x128xf32>
    %70 = vector.broadcast %12 : vector<1x128xf32> to vector<8x128xf32>
    %71 = arith.addf %69, %70 : vector<8x128xf32>
    %cst_35 = arith.constant 2.000000e+01 : f32
    %72 = vector.broadcast %cst_35 : f32 to vector<8x128xf32>
    %73 = arith.minimumf %71, %72 : vector<8x128xf32>
    %74 = math.exp %73 : vector<8x128xf32>
    %cst_36 = arith.constant 2.000000e+00 : f32
    %75 = vector.broadcast %cst_36 : f32 to vector<8x128xf32>
    %76 = arith.addf %74, %75 : vector<8x128xf32>
    %77 = arith.mulf %74, %76 : vector<8x128xf32>
    %78 = arith.mulf %71, %77 : vector<8x128xf32>
    %cst_37 = arith.constant 2.000000e+00 : f32
    %79 = vector.broadcast %cst_37 : f32 to vector<8x128xf32>
    %80 = arith.addf %77, %79 : vector<8x128xf32>
    %81 = tpu.reciprocal %80 {approx = true} : vector<8x128xf32> -> vector<8x128xf32>
    %82 = arith.mulf %78, %81 : vector<8x128xf32>
    %83 = arith.truncf %82 : vector<8x128xf32> to vector<8x128xbf16>
    %cst_38 = arith.constant dense<0.000000e+00> : vector<8x128xf32>
    %84 = tpu.matmul %83, %6, %cst_38 {dimension_numbers = #tpu.dot_dimension_numbers<[1], [0], [0], [1], [0, 0, 1, 1], [], []>} : vector<8x128xbf16>, vector<128x128xbf16>, vector<8x128xf32> -> vector<8x128xf32>
    %85 = vector.broadcast %13 : vector<1x128xf32> to vector<8x128xf32>
    %86 = arith.addf %84, %85 : vector<8x128xf32>
    %c0_39 = arith.constant 0 : index
    %c0_40 = arith.constant 0 : index
    %87 = vector.load %arg2[%c0_39, %c0_40] : memref<8x256xbf16, #tpu.memory_space<vmem>>, vector<8x256xbf16>
    %c1_41 = arith.constant 1 : index
    %c0_42 = arith.constant 0 : index
    %c0_43 = arith.constant 0 : index
    %88 = vector.load %arg3[%c1_41, %c0_42, %c0_43] : memref<2x256x256xbf16, #tpu.memory_space<vmem>>, vector<1x256x256xbf16>
    %89 = vector.shape_cast %88 : vector<1x256x256xbf16> to vector<256x256xbf16>
    %c1_44 = arith.constant 1 : index
    %c0_45 = arith.constant 0 : index
    %c0_46 = arith.constant 0 : index
    %90 = vector.load %arg4[%c1_44, %c0_45, %c0_46] : memref<2x256x128xbf16, #tpu.memory_space<vmem>>, vector<1x256x128xbf16>
    %91 = vector.shape_cast %90 : vector<1x256x128xbf16> to vector<256x128xbf16>
    %c1_47 = arith.constant 1 : index
    %c0_48 = arith.constant 0 : index
    %c0_49 = arith.constant 0 : index
    %92 = vector.load %arg5[%c1_47, %c0_48, %c0_49] : memref<2x128x128xbf16, #tpu.memory_space<vmem>>, vector<1x128x128xbf16>
    %93 = vector.shape_cast %92 : vector<1x128x128xbf16> to vector<128x128xbf16>
    %c3_50 = arith.constant 3 : index
    %c0_51 = arith.constant 0 : index
    %94 = vector.load %arg13[%c3_50, %c0_51] : memref<9x256xf32, #tpu.memory_space<vmem>>, vector<1x256xf32>
    %c4 = arith.constant 4 : index
    %c0_52 = arith.constant 0 : index
    %95 = vector.load %arg13[%c4, %c0_52] : memref<9x256xf32, #tpu.memory_space<vmem>>, vector<1x256xf32>
    %c5 = arith.constant 5 : index
    %c0_53 = arith.constant 0 : index
    %96 = vector.load %arg13[%c5, %c0_53] : memref<9x256xf32, #tpu.memory_space<vmem>>, vector<1x256xf32>
    %c4_54 = arith.constant 4 : index
    %c0_55 = arith.constant 0 : index
    %97 = vector.load %arg12[%c4_54, %c0_55] : memref<15x128xf32, #tpu.memory_space<vmem>>, vector<1x128xf32>
    %c5_56 = arith.constant 5 : index
    %c0_57 = arith.constant 0 : index
    %98 = vector.load %arg12[%c5_56, %c0_57] : memref<15x128xf32, #tpu.memory_space<vmem>>, vector<1x128xf32>
    %c6 = arith.constant 6 : index
    %c0_58 = arith.constant 0 : index
    %99 = vector.load %arg12[%c6, %c0_58] : memref<15x128xf32, #tpu.memory_space<vmem>>, vector<1x128xf32>
    %c7 = arith.constant 7 : index
    %c0_59 = arith.constant 0 : index
    %100 = vector.load %arg12[%c7, %c0_59] : memref<15x128xf32, #tpu.memory_space<vmem>>, vector<1x128xf32>
    %cst_60 = arith.constant dense<0.000000e+00> : vector<8x256xf32>
    %101 = tpu.matmul %87, %89, %cst_60 {dimension_numbers = #tpu.dot_dimension_numbers<[1], [0], [0], [1], [0, 0, 1, 1], [], []>} : vector<8x256xbf16>, vector<256x256xbf16>, vector<8x256xf32> -> vector<8x256xf32>
    %102 = vector.broadcast %94 : vector<1x256xf32> to vector<8x256xf32>
    %103 = arith.addf %101, %102 : vector<8x256xf32>
    %cst_61 = arith.constant dense<0.000000e+00> : vector<8xf32>
    %104 = vector.multi_reduction <add>, %103, %cst_61 [1] : vector<8x256xf32> to vector<8xf32>
    %105 = vector.shape_cast %104 : vector<8xf32> to vector<8x1xf32>
    %cst_62 = arith.constant 2.560000e+02 : f32
    %106 = vector.broadcast %cst_62 : f32 to vector<8x1xf32>
    %107 = arith.divf %105, %106 : vector<8x1xf32>
    %108 = vector.broadcast %107 : vector<8x1xf32> to vector<8x256xf32>
    %109 = arith.subf %103, %108 : vector<8x256xf32>
    %110 = arith.mulf %109, %109 : vector<8x256xf32>
    %cst_63 = arith.constant dense<0.000000e+00> : vector<8xf32>
    %111 = vector.multi_reduction <add>, %110, %cst_63 [1] : vector<8x256xf32> to vector<8xf32>
    %112 = vector.shape_cast %111 : vector<8xf32> to vector<8x1xf32>
    %cst_64 = arith.constant 2.560000e+02 : f32
    %113 = vector.broadcast %cst_64 : f32 to vector<8x1xf32>
    %114 = arith.divf %112, %113 : vector<8x1xf32>
    %cst_65 = arith.constant 9.99999974E-6 : f32
    %115 = vector.broadcast %cst_65 : f32 to vector<8x1xf32>
    %116 = arith.addf %114, %115 : vector<8x1xf32>
    %117 = math.rsqrt %116 : vector<8x1xf32>
    %118 = vector.broadcast %117 : vector<8x1xf32> to vector<8x256xf32>
    %119 = arith.mulf %109, %118 : vector<8x256xf32>
    %120 = vector.broadcast %95 : vector<1x256xf32> to vector<8x256xf32>
    %121 = arith.mulf %119, %120 : vector<8x256xf32>
    %122 = vector.broadcast %96 : vector<1x256xf32> to vector<8x256xf32>
    %123 = arith.addf %121, %122 : vector<8x256xf32>
    %cst_66 = arith.constant 2.000000e+01 : f32
    %124 = vector.broadcast %cst_66 : f32 to vector<8x256xf32>
    %125 = arith.minimumf %123, %124 : vector<8x256xf32>
    %126 = math.exp %125 : vector<8x256xf32>
    %cst_67 = arith.constant 2.000000e+00 : f32
    %127 = vector.broadcast %cst_67 : f32 to vector<8x256xf32>
    %128 = arith.addf %126, %127 : vector<8x256xf32>
    %129 = arith.mulf %126, %128 : vector<8x256xf32>
    %130 = arith.mulf %123, %129 : vector<8x256xf32>
    %cst_68 = arith.constant 2.000000e+00 : f32
    %131 = vector.broadcast %cst_68 : f32 to vector<8x256xf32>
    %132 = arith.addf %129, %131 : vector<8x256xf32>
    %133 = tpu.reciprocal %132 {approx = true} : vector<8x256xf32> -> vector<8x256xf32>
    %134 = arith.mulf %130, %133 : vector<8x256xf32>
    %135 = arith.truncf %134 : vector<8x256xf32> to vector<8x256xbf16>
    %cst_69 = arith.constant dense<0.000000e+00> : vector<8x128xf32>
    %136 = tpu.matmul %135, %91, %cst_69 {dimension_numbers = #tpu.dot_dimension_numbers<[1], [0], [0], [1], [0, 0, 1, 1], [], []>} : vector<8x256xbf16>, vector<256x128xbf16>, vector<8x128xf32> -> vector<8x128xf32>
    %137 = vector.broadcast %97 : vector<1x128xf32> to vector<8x128xf32>
    %138 = arith.addf %136, %137 : vector<8x128xf32>
    %cst_70 = arith.constant dense<0.000000e+00> : vector<8xf32>
    %139 = vector.multi_reduction <add>, %138, %cst_70 [1] : vector<8x128xf32> to vector<8xf32>
    %140 = vector.shape_cast %139 : vector<8xf32> to vector<8x1xf32>
    %cst_71 = arith.constant 1.280000e+02 : f32
    %141 = vector.broadcast %cst_71 : f32 to vector<8x1xf32>
    %142 = arith.divf %140, %141 : vector<8x1xf32>
    %143 = vector.broadcast %142 : vector<8x1xf32> to vector<8x128xf32>
    %144 = arith.subf %138, %143 : vector<8x128xf32>
    %145 = arith.mulf %144, %144 : vector<8x128xf32>
    %cst_72 = arith.constant dense<0.000000e+00> : vector<8xf32>
    %146 = vector.multi_reduction <add>, %145, %cst_72 [1] : vector<8x128xf32> to vector<8xf32>
    %147 = vector.shape_cast %146 : vector<8xf32> to vector<8x1xf32>
    %cst_73 = arith.constant 1.280000e+02 : f32
    %148 = vector.broadcast %cst_73 : f32 to vector<8x1xf32>
    %149 = arith.divf %147, %148 : vector<8x1xf32>
    %cst_74 = arith.constant 9.99999974E-6 : f32
    %150 = vector.broadcast %cst_74 : f32 to vector<8x1xf32>
    %151 = arith.addf %149, %150 : vector<8x1xf32>
    %152 = math.rsqrt %151 : vector<8x1xf32>
    %153 = vector.broadcast %152 : vector<8x1xf32> to vector<8x128xf32>
    %154 = arith.mulf %144, %153 : vector<8x128xf32>
    %155 = vector.broadcast %98 : vector<1x128xf32> to vector<8x128xf32>
    %156 = arith.mulf %154, %155 : vector<8x128xf32>
    %157 = vector.broadcast %99 : vector<1x128xf32> to vector<8x128xf32>
    %158 = arith.addf %156, %157 : vector<8x128xf32>
    %cst_75 = arith.constant 2.000000e+01 : f32
    %159 = vector.broadcast %cst_75 : f32 to vector<8x128xf32>
    %160 = arith.minimumf %158, %159 : vector<8x128xf32>
    %161 = math.exp %160 : vector<8x128xf32>
    %cst_76 = arith.constant 2.000000e+00 : f32
    %162 = vector.broadcast %cst_76 : f32 to vector<8x128xf32>
    %163 = arith.addf %161, %162 : vector<8x128xf32>
    %164 = arith.mulf %161, %163 : vector<8x128xf32>
    %165 = arith.mulf %158, %164 : vector<8x128xf32>
    %cst_77 = arith.constant 2.000000e+00 : f32
    %166 = vector.broadcast %cst_77 : f32 to vector<8x128xf32>
    %167 = arith.addf %164, %166 : vector<8x128xf32>
    %168 = tpu.reciprocal %167 {approx = true} : vector<8x128xf32> -> vector<8x128xf32>
    %169 = arith.mulf %165, %168 : vector<8x128xf32>
    %170 = arith.truncf %169 : vector<8x128xf32> to vector<8x128xbf16>
    %cst_78 = arith.constant dense<0.000000e+00> : vector<8x128xf32>
    %171 = tpu.matmul %170, %93, %cst_78 {dimension_numbers = #tpu.dot_dimension_numbers<[1], [0], [0], [1], [0, 0, 1, 1], [], []>} : vector<8x128xbf16>, vector<128x128xbf16>, vector<8x128xf32> -> vector<8x128xf32>
    %172 = vector.broadcast %100 : vector<1x128xf32> to vector<8x128xf32>
    %173 = arith.addf %171, %172 : vector<8x128xf32>
    %174 = arith.truncf %86 : vector<8x128xf32> to vector<8x128xbf16>
    %c0_79 = arith.constant 0 : index
    %c0_80 = arith.constant 0 : index
    %175 = vector.load %arg6[%c0_79, %c0_80] : memref<128x256xbf16, #tpu.memory_space<vmem>>, vector<128x256xbf16>
    %c0_81 = arith.constant 0 : index
    %c0_82 = arith.constant 0 : index
    %176 = vector.load %arg14[%c0_81, %c0_82] : memref<2x256xf32, #tpu.memory_space<vmem>>, vector<1x256xf32>
    %cst_83 = arith.constant dense<0.000000e+00> : vector<8x256xf32>
    %177 = tpu.matmul %174, %175, %cst_83 {dimension_numbers = #tpu.dot_dimension_numbers<[1], [0], [0], [1], [0, 0, 1, 1], [], []>} : vector<8x128xbf16>, vector<128x256xbf16>, vector<8x256xf32> -> vector<8x256xf32>
    %178 = vector.broadcast %176 : vector<1x256xf32> to vector<8x256xf32>
    %179 = arith.addf %177, %178 : vector<8x256xf32>
    %c0_84 = arith.constant 0 : index
    %c0_85 = arith.constant 0 : index
    %180 = vector.load %arg16[%c0_84, %c0_85] : memref<8x256xf32, #tpu.memory_space<vmem>>, vector<8x256xf32>
    tpu.vector_store %arg16[%c0_84, %c0_85], %179 {strides = array<i32>} : memref<8x256xf32, #tpu.memory_space<vmem>>, vector<8x256xf32>,
    %181 = arith.truncf %179 : vector<8x256xf32> to vector<8x256xbf16>
    %c0_86 = arith.constant 0 : index
    %c0_87 = arith.constant 0 : index
    %182 = vector.load %arg8[%c0_86, %c0_87] : memref<256x128xbf16, #tpu.memory_space<vmem>>, vector<256x128xbf16>
    %cst_88 = arith.constant dense<0.000000e+00> : vector<8x128xf32>
    %183 = tpu.matmul %181, %182, %cst_88 {dimension_numbers = #tpu.dot_dimension_numbers<[1], [0], [0], [1], [0, 0, 1, 1], [], []>} : vector<8x256xbf16>, vector<256x128xbf16>, vector<8x128xf32> -> vector<8x128xf32>
    %c0_89 = arith.constant 0 : index
    %c0_90 = arith.constant 0 : index
    %184 = vector.load %arg19[%c0_89, %c0_90] : memref<16x128xf32, #tpu.memory_space<vmem>>, vector<8x128xf32>
    tpu.vector_store %arg19[%c0_89, %c0_90], %86 {strides = array<i32>} : memref<16x128xf32, #tpu.memory_space<vmem>>, vector<8x128xf32>,
    %c8 = arith.constant 8 : index
    %c0_91 = arith.constant 0 : index
    %185 = vector.load %arg19[%c8, %c0_91] : memref<16x128xf32, #tpu.memory_space<vmem>>, vector<8x128xf32>
    tpu.vector_store %arg19[%c8, %c0_91], %173 {strides = array<i32>} : memref<16x128xf32, #tpu.memory_space<vmem>>, vector<8x128xf32>,
    %c0_92 = arith.constant 0 : index
    %c0_93 = arith.constant 0 : index
    %186 = vector.load %arg19[%c0_92, %c0_93] : memref<16x128xf32, #tpu.memory_space<vmem>>, vector<16x128xf32>
    %187 = arith.truncf %186 : vector<16x128xf32> to vector<16x128xbf16>
    %c0_94 = arith.constant 0 : index
    %c0_95 = arith.constant 0 : index
    %188 = vector.load %arg7[%c0_94, %c0_95] : memref<128x128xbf16, #tpu.memory_space<vmem>>, vector<128x128xbf16>
    %cst_96 = arith.constant dense<0.000000e+00> : vector<16x128xf32>
    %189 = tpu.matmul %187, %188, %cst_96 {dimension_numbers = #tpu.dot_dimension_numbers<[1], [0], [0], [1], [0, 0, 1, 1], [], []>} : vector<16x128xbf16>, vector<128x128xbf16>, vector<16x128xf32> -> vector<16x128xf32>
    %c8_97 = arith.constant 8 : index
    %c0_98 = arith.constant 0 : index
    %190 = vector.load %arg12[%c8_97, %c0_98] : memref<15x128xf32, #tpu.memory_space<vmem>>, vector<1x128xf32>
    %191 = vector.broadcast %190 : vector<1x128xf32> to vector<16x128xf32>
    %192 = arith.addf %189, %191 : vector<16x128xf32>
    %193 = vector.extract_strided_slice %192 {offsets = [0, 0], sizes = [8, 128], strides = [1, 1]} : vector<16x128xf32> to vector<8x128xf32>
    %194 = arith.addf %193, %183 : vector<8x128xf32>
    %195 = vector.extract_strided_slice %192 {offsets = [8, 0], sizes = [8, 128], strides = [1, 1]} : vector<16x128xf32> to vector<8x128xf32>
    %c11 = arith.constant 11 : index
    %c0_99 = arith.constant 0 : index
    %196 = vector.load %arg12[%c11, %c0_99] : memref<15x128xf32, #tpu.memory_space<vmem>>, vector<1x128xf32>
    %197 = vector.broadcast %196 : vector<1x128xf32> to vector<8x128xf32>
    %198 = arith.subf %197, %183 : vector<8x128xf32>
    %199 = arith.addf %195, %198 : vector<8x128xf32>
    %c9 = arith.constant 9 : index
    %c0_100 = arith.constant 0 : index
    %200 = vector.load %arg12[%c9, %c0_100] : memref<15x128xf32, #tpu.memory_space<vmem>>, vector<1x128xf32>
    %c10 = arith.constant 10 : index
    %c0_101 = arith.constant 0 : index
    %201 = vector.load %arg12[%c10, %c0_101] : memref<15x128xf32, #tpu.memory_space<vmem>>, vector<1x128xf32>
    %cst_102 = arith.constant dense<0.000000e+00> : vector<8xf32>
    %202 = vector.multi_reduction <add>, %194, %cst_102 [1] : vector<8x128xf32> to vector<8xf32>
    %203 = vector.shape_cast %202 : vector<8xf32> to vector<8x1xf32>
    %cst_103 = arith.constant 1.280000e+02 : f32
    %204 = vector.broadcast %cst_103 : f32 to vector<8x1xf32>
    %205 = arith.divf %203, %204 : vector<8x1xf32>
    %206 = vector.broadcast %205 : vector<8x1xf32> to vector<8x128xf32>
    %207 = arith.subf %194, %206 : vector<8x128xf32>
    %208 = arith.mulf %207, %207 : vector<8x128xf32>
    %cst_104 = arith.constant dense<0.000000e+00> : vector<8xf32>
    %209 = vector.multi_reduction <add>, %208, %cst_104 [1] : vector<8x128xf32> to vector<8xf32>
    %210 = vector.shape_cast %209 : vector<8xf32> to vector<8x1xf32>
    %cst_105 = arith.constant 1.280000e+02 : f32
    %211 = vector.broadcast %cst_105 : f32 to vector<8x1xf32>
    %212 = arith.divf %210, %211 : vector<8x1xf32>
    %cst_106 = arith.constant 9.99999974E-6 : f32
    %213 = vector.broadcast %cst_106 : f32 to vector<8x1xf32>
    %214 = arith.addf %212, %213 : vector<8x1xf32>
    %215 = math.rsqrt %214 : vector<8x1xf32>
    %216 = vector.broadcast %215 : vector<8x1xf32> to vector<8x128xf32>
    %217 = arith.mulf %207, %216 : vector<8x128xf32>
    %218 = vector.broadcast %200 : vector<1x128xf32> to vector<8x128xf32>
    %219 = arith.mulf %217, %218 : vector<8x128xf32>
    %220 = vector.broadcast %201 : vector<1x128xf32> to vector<8x128xf32>
    %221 = arith.addf %219, %220 : vector<8x128xf32>
    %cst_107 = arith.constant 2.000000e+01 : f32
    %222 = vector.broadcast %cst_107 : f32 to vector<8x128xf32>
    %223 = arith.minimumf %221, %222 : vector<8x128xf32>
    %224 = math.exp %223 : vector<8x128xf32>
    %cst_108 = arith.constant 2.000000e+00 : f32
    %225 = vector.broadcast %cst_108 : f32 to vector<8x128xf32>
    %226 = arith.addf %224, %225 : vector<8x128xf32>
    %227 = arith.mulf %224, %226 : vector<8x128xf32>
    %228 = arith.mulf %221, %227 : vector<8x128xf32>
    %cst_109 = arith.constant 2.000000e+00 : f32
    %229 = vector.broadcast %cst_109 : f32 to vector<8x128xf32>
    %230 = arith.addf %227, %229 : vector<8x128xf32>
    %231 = tpu.reciprocal %230 {approx = true} : vector<8x128xf32> -> vector<8x128xf32>
    %232 = arith.mulf %228, %231 : vector<8x128xf32>
    %cst_110 = arith.constant dense<0.000000e+00> : vector<8xf32>
    %233 = vector.multi_reduction <add>, %199, %cst_110 [1] : vector<8x128xf32> to vector<8xf32>
    %234 = vector.shape_cast %233 : vector<8xf32> to vector<8x1xf32>
    %cst_111 = arith.constant 1.280000e+02 : f32
    %235 = vector.broadcast %cst_111 : f32 to vector<8x1xf32>
    %236 = arith.divf %234, %235 : vector<8x1xf32>
    %237 = vector.broadcast %236 : vector<8x1xf32> to vector<8x128xf32>
    %238 = arith.subf %199, %237 : vector<8x128xf32>
    %239 = arith.mulf %238, %238 : vector<8x128xf32>
    %cst_112 = arith.constant dense<0.000000e+00> : vector<8xf32>
    %240 = vector.multi_reduction <add>, %239, %cst_112 [1] : vector<8x128xf32> to vector<8xf32>
    %241 = vector.shape_cast %240 : vector<8xf32> to vector<8x1xf32>
    %cst_113 = arith.constant 1.280000e+02 : f32
    %242 = vector.broadcast %cst_113 : f32 to vector<8x1xf32>
    %243 = arith.divf %241, %242 : vector<8x1xf32>
    %cst_114 = arith.constant 9.99999974E-6 : f32
    %244 = vector.broadcast %cst_114 : f32 to vector<8x1xf32>
    %245 = arith.addf %243, %244 : vector<8x1xf32>
    %246 = math.rsqrt %245 : vector<8x1xf32>
    %247 = vector.broadcast %246 : vector<8x1xf32> to vector<8x128xf32>
    %248 = arith.mulf %238, %247 : vector<8x128xf32>
    %249 = vector.broadcast %200 : vector<1x128xf32> to vector<8x128xf32>
    %250 = arith.mulf %248, %249 : vector<8x128xf32>
    %251 = vector.broadcast %201 : vector<1x128xf32> to vector<8x128xf32>
    %252 = arith.addf %250, %251 : vector<8x128xf32>
    %cst_115 = arith.constant 2.000000e+01 : f32
    %253 = vector.broadcast %cst_115 : f32 to vector<8x128xf32>
    %254 = arith.minimumf %252, %253 : vector<8x128xf32>
    %255 = math.exp %254 : vector<8x128xf32>
    %cst_116 = arith.constant 2.000000e+00 : f32
    %256 = vector.broadcast %cst_116 : f32 to vector<8x128xf32>
    %257 = arith.addf %255, %256 : vector<8x128xf32>
    %258 = arith.mulf %255, %257 : vector<8x128xf32>
    %259 = arith.mulf %252, %258 : vector<8x128xf32>
    %cst_117 = arith.constant 2.000000e+00 : f32
    %260 = vector.broadcast %cst_117 : f32 to vector<8x128xf32>
    %261 = arith.addf %258, %260 : vector<8x128xf32>
    %262 = tpu.reciprocal %261 {approx = true} : vector<8x128xf32> -> vector<8x128xf32>
    %263 = arith.mulf %259, %262 : vector<8x128xf32>
    %c0_118 = arith.constant 0 : index
    %c0_119 = arith.constant 0 : index
    %264 = vector.load %arg17[%c0_118, %c0_119] : memref<8x128xf32, #tpu.memory_space<vmem>>, vector<8x128xf32>
    tpu.vector_store %arg17[%c0_118, %c0_119], %232 {strides = array<i32>} : memref<8x128xf32, #tpu.memory_space<vmem>>, vector<8x128xf32>,
    %c0_120 = arith.constant 0 : index
    %c0_121 = arith.constant 0 : index
    %265 = vector.load %arg18[%c0_120, %c0_121] : memref<8x128xf32, #tpu.memory_space<vmem>>, vector<8x128xf32>
    tpu.vector_store %arg18[%c0_120, %c0_121], %263 {strides = array<i32>} : memref<8x128xf32, #tpu.memory_space<vmem>>, vector<8x128xf32>,
    %266 = arith.truncf %232 : vector<8x128xf32> to vector<8x128xbf16>
    %c0_122 = arith.constant 0 : index
    %c0_123 = arith.constant 0 : index
    %267 = vector.load %arg9[%c0_122, %c0_123] : memref<128x128xbf16, #tpu.memory_space<vmem>>, vector<128x128xbf16>
    %c12 = arith.constant 12 : index
    %c0_124 = arith.constant 0 : index
    %268 = vector.load %arg12[%c12, %c0_124] : memref<15x128xf32, #tpu.memory_space<vmem>>, vector<1x128xf32>
    %cst_125 = arith.constant dense<0.000000e+00> : vector<8x128xf32>
    %269 = tpu.matmul %266, %267, %cst_125 {dimension_numbers = #tpu.dot_dimension_numbers<[1], [0], [0], [1], [0, 0, 1, 1], [], []>} : vector<8x128xbf16>, vector<128x128xbf16>, vector<8x128xf32> -> vector<8x128xf32>
    %270 = vector.broadcast %268 : vector<1x128xf32> to vector<8x128xf32>
    %271 = arith.addf %269, %270 : vector<8x128xf32>
    %c13 = arith.constant 13 : index
    %c0_126 = arith.constant 0 : index
    %272 = vector.load %arg12[%c13, %c0_126] : memref<15x128xf32, #tpu.memory_space<vmem>>, vector<1x128xf32>
    %c14 = arith.constant 14 : index
    %c0_127 = arith.constant 0 : index
    %273 = vector.load %arg12[%c14, %c0_127] : memref<15x128xf32, #tpu.memory_space<vmem>>, vector<1x128xf32>
    %cst_128 = arith.constant dense<0.000000e+00> : vector<8xf32>
    %274 = vector.multi_reduction <add>, %271, %cst_128 [1] : vector<8x128xf32> to vector<8xf32>
    %275 = vector.shape_cast %274 : vector<8xf32> to vector<8x1xf32>
    %cst_129 = arith.constant 1.280000e+02 : f32
    %276 = vector.broadcast %cst_129 : f32 to vector<8x1xf32>
    %277 = arith.divf %275, %276 : vector<8x1xf32>
    %278 = vector.broadcast %277 : vector<8x1xf32> to vector<8x128xf32>
    %279 = arith.subf %271, %278 : vector<8x128xf32>
    %280 = arith.mulf %279, %279 : vector<8x128xf32>
    %cst_130 = arith.constant dense<0.000000e+00> : vector<8xf32>
    %281 = vector.multi_reduction <add>, %280, %cst_130 [1] : vector<8x128xf32> to vector<8xf32>
    %282 = vector.shape_cast %281 : vector<8xf32> to vector<8x1xf32>
    %cst_131 = arith.constant 1.280000e+02 : f32
    %283 = vector.broadcast %cst_131 : f32 to vector<8x1xf32>
    %284 = arith.divf %282, %283 : vector<8x1xf32>
    %cst_132 = arith.constant 9.99999974E-6 : f32
    %285 = vector.broadcast %cst_132 : f32 to vector<8x1xf32>
    %286 = arith.addf %284, %285 : vector<8x1xf32>
    %287 = math.rsqrt %286 : vector<8x1xf32>
    %288 = vector.broadcast %287 : vector<8x1xf32> to vector<8x128xf32>
    %289 = arith.mulf %279, %288 : vector<8x128xf32>
    %290 = vector.broadcast %272 : vector<1x128xf32> to vector<8x128xf32>
    %291 = arith.mulf %289, %290 : vector<8x128xf32>
    %292 = vector.broadcast %273 : vector<1x128xf32> to vector<8x128xf32>
    %293 = arith.addf %291, %292 : vector<8x128xf32>
    %cst_133 = arith.constant 2.000000e+01 : f32
    %294 = vector.broadcast %cst_133 : f32 to vector<8x128xf32>
    %295 = arith.minimumf %293, %294 : vector<8x128xf32>
    %296 = math.exp %295 : vector<8x128xf32>
    %cst_134 = arith.constant 2.000000e+00 : f32
    %297 = vector.broadcast %cst_134 : f32 to vector<8x128xf32>
    %298 = arith.addf %296, %297 : vector<8x128xf32>
    %299 = arith.mulf %296, %298 : vector<8x128xf32>
    %300 = arith.mulf %293, %299 : vector<8x128xf32>
    %cst_135 = arith.constant 2.000000e+00 : f32
    %301 = vector.broadcast %cst_135 : f32 to vector<8x128xf32>
    %302 = arith.addf %299, %301 : vector<8x128xf32>
    %303 = tpu.reciprocal %302 {approx = true} : vector<8x128xf32> -> vector<8x128xf32>
    %304 = arith.mulf %300, %303 : vector<8x128xf32>
    %305 = arith.truncf %304 : vector<8x128xf32> to vector<8x128xbf16>
    %c0_136 = arith.constant 0 : index
    %c0_137 = arith.constant 0 : index
    %306 = vector.load %arg10[%c0_136, %c0_137] : memref<128x256xbf16, #tpu.memory_space<vmem>>, vector<128x256xbf16>
    %c6_138 = arith.constant 6 : index
    %c0_139 = arith.constant 0 : index
    %307 = vector.load %arg13[%c6_138, %c0_139] : memref<9x256xf32, #tpu.memory_space<vmem>>, vector<1x256xf32>
    %cst_140 = arith.constant dense<0.000000e+00> : vector<8x256xf32>
    %308 = tpu.matmul %305, %306, %cst_140 {dimension_numbers = #tpu.dot_dimension_numbers<[1], [0], [0], [1], [0, 0, 1, 1], [], []>} : vector<8x128xbf16>, vector<128x256xbf16>, vector<8x256xf32> -> vector<8x256xf32>
    %309 = vector.broadcast %307 : vector<1x256xf32> to vector<8x256xf32>
    %310 = arith.addf %308, %309 : vector<8x256xf32>
    %c7_141 = arith.constant 7 : index
    %c0_142 = arith.constant 0 : index
    %311 = vector.load %arg13[%c7_141, %c0_142] : memref<9x256xf32, #tpu.memory_space<vmem>>, vector<1x256xf32>
    %c8_143 = arith.constant 8 : index
    %c0_144 = arith.constant 0 : index
    %312 = vector.load %arg13[%c8_143, %c0_144] : memref<9x256xf32, #tpu.memory_space<vmem>>, vector<1x256xf32>
    %cst_145 = arith.constant dense<0.000000e+00> : vector<8xf32>
    %313 = vector.multi_reduction <add>, %310, %cst_145 [1] : vector<8x256xf32> to vector<8xf32>
    %314 = vector.shape_cast %313 : vector<8xf32> to vector<8x1xf32>
    %cst_146 = arith.constant 2.560000e+02 : f32
    %315 = vector.broadcast %cst_146 : f32 to vector<8x1xf32>
    %316 = arith.divf %314, %315 : vector<8x1xf32>
    %317 = vector.broadcast %316 : vector<8x1xf32> to vector<8x256xf32>
    %318 = arith.subf %310, %317 : vector<8x256xf32>
    %319 = arith.mulf %318, %318 : vector<8x256xf32>
    %cst_147 = arith.constant dense<0.000000e+00> : vector<8xf32>
    %320 = vector.multi_reduction <add>, %319, %cst_147 [1] : vector<8x256xf32> to vector<8xf32>
    %321 = vector.shape_cast %320 : vector<8xf32> to vector<8x1xf32>
    %cst_148 = arith.constant 2.560000e+02 : f32
    %322 = vector.broadcast %cst_148 : f32 to vector<8x1xf32>
    %323 = arith.divf %321, %322 : vector<8x1xf32>
    %cst_149 = arith.constant 9.99999974E-6 : f32
    %324 = vector.broadcast %cst_149 : f32 to vector<8x1xf32>
    %325 = arith.addf %323, %324 : vector<8x1xf32>
    %326 = math.rsqrt %325 : vector<8x1xf32>
    %327 = vector.broadcast %326 : vector<8x1xf32> to vector<8x256xf32>
    %328 = arith.mulf %318, %327 : vector<8x256xf32>
    %329 = vector.broadcast %311 : vector<1x256xf32> to vector<8x256xf32>
    %330 = arith.mulf %328, %329 : vector<8x256xf32>
    %331 = vector.broadcast %312 : vector<1x256xf32> to vector<8x256xf32>
    %332 = arith.addf %330, %331 : vector<8x256xf32>
    %cst_150 = arith.constant 2.000000e+01 : f32
    %333 = vector.broadcast %cst_150 : f32 to vector<8x256xf32>
    %334 = arith.minimumf %332, %333 : vector<8x256xf32>
    %335 = math.exp %334 : vector<8x256xf32>
    %cst_151 = arith.constant 2.000000e+00 : f32
    %336 = vector.broadcast %cst_151 : f32 to vector<8x256xf32>
    %337 = arith.addf %335, %336 : vector<8x256xf32>
    %338 = arith.mulf %335, %337 : vector<8x256xf32>
    %339 = arith.mulf %332, %338 : vector<8x256xf32>
    %cst_152 = arith.constant 2.000000e+00 : f32
    %340 = vector.broadcast %cst_152 : f32 to vector<8x256xf32>
    %341 = arith.addf %338, %340 : vector<8x256xf32>
    %342 = tpu.reciprocal %341 {approx = true} : vector<8x256xf32> -> vector<8x256xf32>
    %343 = arith.mulf %339, %342 : vector<8x256xf32>
    %344 = arith.truncf %343 : vector<8x256xf32> to vector<8x256xbf16>
    %c0_153 = arith.constant 0 : index
    %c0_154 = arith.constant 0 : index
    %345 = vector.load %arg11[%c0_153, %c0_154] : memref<256x256xbf16, #tpu.memory_space<vmem>>, vector<256x256xbf16>
    %c1_155 = arith.constant 1 : index
    %c0_156 = arith.constant 0 : index
    %346 = vector.load %arg14[%c1_155, %c0_156] : memref<2x256xf32, #tpu.memory_space<vmem>>, vector<1x256xf32>
    %cst_157 = arith.constant dense<0.000000e+00> : vector<8x256xf32>
    %347 = tpu.matmul %344, %345, %cst_157 {dimension_numbers = #tpu.dot_dimension_numbers<[1], [0], [0], [1], [0, 0, 1, 1], [], []>} : vector<8x256xbf16>, vector<256x256xbf16>, vector<8x256xf32> -> vector<8x256xf32>
    %348 = vector.broadcast %346 : vector<1x256xf32> to vector<8x256xf32>
    %349 = arith.addf %347, %348 : vector<8x256xf32>
    %c0_158 = arith.constant 0 : index
    %c0_159 = arith.constant 0 : index
    %350 = vector.load %arg15[%c0_158, %c0_159] : memref<8x256xf32, #tpu.memory_space<vmem>>, vector<8x256xf32>
    tpu.vector_store %arg15[%c0_158, %c0_159], %349 {strides = array<i32>} : memref<8x256xf32, #tpu.memory_space<vmem>>, vector<8x256xf32>,
    return
  }
  func.func @transform_0(%arg0: i32) -> (i32, i32) {
    %c0_i32 = arith.constant 0 : i32
    %c0_i32_0 = arith.constant 0 : i32
    return %arg0, %c0_i32 : i32, i32
  }
  func.func @transform_1(%arg0: i32) -> (i32, i32) {
    %c0_i32 = arith.constant 0 : i32
    %c0_i32_0 = arith.constant 0 : i32
    return %arg0, %c0_i32 : i32, i32
  }
  func.func @transform_2(%arg0: i32) -> (i32, i32, i32) {
    %c0_i32 = arith.constant 0 : i32
    %c0_i32_0 = arith.constant 0 : i32
    %c0_i32_1 = arith.constant 0 : i32
    %c0_i32_2 = arith.constant 0 : i32
    return %c0_i32, %c0_i32_0, %c0_i32_1 : i32, i32, i32
  }
  func.func @transform_3(%arg0: i32) -> (i32, i32, i32) {
    %c0_i32 = arith.constant 0 : i32
    %c0_i32_0 = arith.constant 0 : i32
    %c0_i32_1 = arith.constant 0 : i32
    %c0_i32_2 = arith.constant 0 : i32
    return %c0_i32, %c0_i32_0, %c0_i32_1 : i32, i32, i32
  }
  func.func @transform_4(%arg0: i32) -> (i32, i32, i32) {
    %c0_i32 = arith.constant 0 : i32
    %c0_i32_0 = arith.constant 0 : i32
    %c0_i32_1 = arith.constant 0 : i32
    %c0_i32_2 = arith.constant 0 : i32
    return %c0_i32, %c0_i32_0, %c0_i32_1 : i32, i32, i32
  }
  func.func @transform_5(%arg0: i32) -> (i32, i32) {
    %c0_i32 = arith.constant 0 : i32
    %c0_i32_0 = arith.constant 0 : i32
    %c0_i32_1 = arith.constant 0 : i32
    return %c0_i32, %c0_i32_0 : i32, i32
  }
  func.func @transform_6(%arg0: i32) -> (i32, i32) {
    %c0_i32 = arith.constant 0 : i32
    %c0_i32_0 = arith.constant 0 : i32
    %c0_i32_1 = arith.constant 0 : i32
    return %c0_i32, %c0_i32_0 : i32, i32
  }
  func.func @transform_7(%arg0: i32) -> (i32, i32) {
    %c0_i32 = arith.constant 0 : i32
    %c0_i32_0 = arith.constant 0 : i32
    %c0_i32_1 = arith.constant 0 : i32
    return %c0_i32, %c0_i32_0 : i32, i32
  }
  func.func @transform_8(%arg0: i32) -> (i32, i32) {
    %c0_i32 = arith.constant 0 : i32
    %c0_i32_0 = arith.constant 0 : i32
    %c0_i32_1 = arith.constant 0 : i32
    return %c0_i32, %c0_i32_0 : i32, i32
  }
  func.func @transform_9(%arg0: i32) -> (i32, i32) {
    %c0_i32 = arith.constant 0 : i32
    %c0_i32_0 = arith.constant 0 : i32
    %c0_i32_1 = arith.constant 0 : i32
    return %c0_i32, %c0_i32_0 : i32, i32
  }
  func.func @transform_10(%arg0: i32) -> (i32, i32) {
    %c0_i32 = arith.constant 0 : i32
    %c0_i32_0 = arith.constant 0 : i32
    %c0_i32_1 = arith.constant 0 : i32
    return %c0_i32, %c0_i32_0 : i32, i32
  }
  func.func @transform_11(%arg0: i32) -> (i32, i32) {
    %c0_i32 = arith.constant 0 : i32
    %c0_i32_0 = arith.constant 0 : i32
    %c0_i32_1 = arith.constant 0 : i32
    return %c0_i32, %c0_i32_0 : i32, i32
  }
  func.func @transform_12(%arg0: i32) -> (i32, i32) {
    %c0_i32 = arith.constant 0 : i32
    %c0_i32_0 = arith.constant 0 : i32
    %c0_i32_1 = arith.constant 0 : i32
    return %c0_i32, %c0_i32_0 : i32, i32
  }
  func.func @transform_13(%arg0: i32) -> (i32, i32) {
    %c0_i32 = arith.constant 0 : i32
    %c0_i32_0 = arith.constant 0 : i32
    %c0_i32_1 = arith.constant 0 : i32
    return %c0_i32, %c0_i32_0 : i32, i32
  }
  func.func @transform_14(%arg0: i32) -> (i32, i32) {
    %c0_i32 = arith.constant 0 : i32
    %c0_i32_0 = arith.constant 0 : i32
    return %arg0, %c0_i32 : i32, i32
  }
  func.func @transform_15(%arg0: i32) -> (i32, i32) {
    %c0_i32 = arith.constant 0 : i32
    %c0_i32_0 = arith.constant 0 : i32
    return %arg0, %c0_i32 : i32, i32
  }
  func.func @transform_16(%arg0: i32) -> (i32, i32) {
    %c0_i32 = arith.constant 0 : i32
    %c0_i32_0 = arith.constant 0 : i32
    return %arg0, %c0_i32 : i32, i32
  }
  func.func @transform_17(%arg0: i32) -> (i32, i32) {
    %c0_i32 = arith.constant 0 : i32
    %c0_i32_0 = arith.constant 0 : i32
    return %arg0, %c0_i32 : i32, i32
  }
}

</mosaic_0001>

<bundles_post_ra>
// kernel: autoencoder_forward.1
= control target key start
LH: loop header
LB: loop body
LE: loop exit
PB: predicated region body
PF: predicated region fallthrough
CT: control target
= control target key end

     0   :  { %s4072_s0 = inlined_call_operand.vmem [shape: bf16[8,256], index: 0, kind: input, shape index: {}]   ;;  %s4073_s1 = inlined_call_operand.vmem [shape: bf16[8,256], index: 1, kind: input, shape index: {}]   ;;  %s4074_s2 = inlined_call_operand.hbm [shape: bf16[2,256,256], index: 2, kind: input, shape index: {}]   ;;  %s4075_s3 = inlined_call_operand.hbm [shape: bf16[2,256,128], index: 3, kind: input, shape index: {}]   ;;  %s4076_s4 = inlined_call_operand.hbm [shape: bf16[2,128,128], index: 4, kind: input, shape index: {}]   ;;  %s4077_s5 = inlined_call_operand.hbm [shape: bf16[128,256], index: 5, kind: input, shape index: {}]   ;;  %s4078_s6 = inlined_call_operand.hbm [shape: bf16[128,128], index: 6, kind: input, shape index: {}]   ;;  %s4079_s7 = inlined_call_operand.hbm [shape: bf16[256,128], index: 7, kind: input, shape index: {}]   ;;  %s4080_s8 = inlined_call_operand.hbm [shape: bf16[128,128], index: 8, kind: input, shape index: {}]   ;;  %s4081_s9 = inlined_call_operand.hbm [shape: bf16[128,256], index: 9, kind: input, shape index: {}]   ;;  %s4082_s10 = inlined_call_operand.hbm [shape: bf16[256,256], index: 10, kind: input, shape index: {}]   ;;  %s4083_s11 = inlined_call_operand.hbm [shape: f32[15,128], index: 11, kind: input, shape index: {}]   ;;  %s4084_s12 = inlined_call_operand.vmem [shape: f32[9,256], index: 12, kind: input, shape index: {}]   ;;  %s4085_s13 = inlined_call_operand.vmem [shape: f32[2,256], index: 13, kind: input, shape index: {}]   ;;  %s4086_s14 = inlined_call_operand.hbm [shape: f32[8,256], index: 14, kind: output, shape index: {0}]   ;;  %s4087_s15 = inlined_call_operand.hbm [shape: f32[8,256], index: 15, kind: output, shape index: {1}]   ;;  %s4088_s16 = inlined_call_operand.hbm [shape: f32[8,128], index: 16, kind: output, shape index: {2}]   ;;  %s4089_s17 = inlined_call_operand.hbm [shape: f32[8,128], index: 17, kind: output, shape index: {3}]  }
   0x1   :  { %4090 = sst [smem:[#allocation35_spill]] %s4072_s0 }
   0x2   :  { %4091 = sst [smem:[#allocation36_spill]] %s4073_s1 }
   0x3   :  { %23 = vsyncpa [#allocation4], 0 }
   0x4   :  { %24 = vsyncpa [#allocation7], 0 }
   0x5   :  { %25 = vsyncpa [#allocation10], 0 }
   0x6   :  { %26 = vsyncpa [#allocation13], 0 }
   0x7   :  { %27 = vsyncpa [#allocation16], 0 }
   0x8   :  { %28 = vsyncpa [#allocation19], 0 }
   0x9   :  { %29 = vsyncpa [#allocation5], 0 }
   0xa   :  { %30 = vsyncpa [#allocation22], 0 }
   0xb   :  { %31 = vsyncpa [#allocation25], 0  ;;  %s3707_s24 = smov [#allocation6]  }
   0xc   :  { %s53_s25 = sshll.u32 %s3707_s24, 4  ;;  %s54_s25 = int_to_ptr.vmem [resolvable:$true] %s53_s25 }
   0xd   :  { %s3417_s26 = scalar_lea.vmem %s54_s25, 4096  ;;  %p3422_p1 = scmp.lt.s32.totalorder %s54_s25, %s54_s25 }
   0xe   :  { %p3418_p0 = scmp.ne.s32.totalorder %s54_s25, %s3417_s26  ;;  %p3423_p2 = scmp.lt.s32.totalorder %s3417_s26, %s3417_s26 }
  0x10   :  { %p3424_p3 = por %p3423_p2, %p3422_p1 }
  0x12   :  { %p3425_p4 = pnand %p3424_p3, %p3418_p0 }
  0x14   :  { %3428 = shalt.err (!%p3425_p4)
}
  0x15   :  { %s3708_s27 = smov 64   ;;  %s3709_s28 = smov 4  }
  0x16   :  { %59 = dma.hbm_to_vmem [thread:$0]  %s4075_s3, 4096, %s54_s25, [#allocation7], %s3708_s27, %s3708_s27, %s3709_s28  }
  0x17   :  { %s3710_s30 = smov [#allocation9]   ;;  %s3711_s19 = smov [#allocation12]  }
  0x18   :  { %s77_s18 = sshll.u32 %s3710_s30, 4  ;;  %s101_s1 = sshll.u32 %s3711_s19, 4  ;;  %s78_s18 = int_to_ptr.vmem [resolvable:$true] %s77_s18  ;;  %s102_s1 = int_to_ptr.vmem [resolvable:$true] %s101_s1 }
  0x19   :  { %s3437_s20 = scalar_lea.vmem %s78_s18, 2048  ;;  %p3442_p6 = scmp.lt.s32.totalorder %s78_s18, %s78_s18 }
  0x1a   :  { %p3438_p5 = scmp.ne.s32.totalorder %s78_s18, %s3437_s20  ;;  %p3443_p7 = scmp.lt.s32.totalorder %s3437_s20, %s3437_s20 }
  0x1c   :  { %p3444_p8 = por %p3443_p7, %p3442_p6 }
  0x1e   :  { %p3445_p9 = pnand %p3444_p8, %p3438_p5 }
  0x20   :  { %3448 = shalt.err (!%p3445_p9)
}
  0x21   :  { %s3712_s21 = smov 128   ;;  %s3713_s22 = smov 8  }
  0x22   :  { %83 = dma.hbm_to_vmem [thread:$0]  %s4077_s5, 2048, %s78_s18, [#allocation10], %s3712_s21, %s3712_s21, %s3713_s22  }
  0x23   :  { %s3457_s3 = scalar_lea.vmem %s102_s1, 2048  ;;  %p3462_p11 = scmp.lt.s32.totalorder %s102_s1, %s102_s1 }
  0x24   :  { %p3458_p10 = scmp.ne.s32.totalorder %s102_s1, %s3457_s3  ;;  %p3463_p12 = scmp.lt.s32.totalorder %s3457_s3, %s3457_s3 }
  0x26   :  { %p3464_p13 = por %p3463_p12, %p3462_p11 }
  0x28   :  { %p3465_p0 = pnand %p3464_p13, %p3458_p10 }
  0x2a   :  { %3468 = shalt.err (!%p3465_p0)
}
  0x2b   :  { %107 = dma.hbm_to_vmem [thread:$0]  %s4079_s7, 2048, %s102_s1, [#allocation13], %s3708_s27, %s3708_s27, %s3709_s28  }
  0x2c   :  { %s3714_s29 = smov [#allocation15]   ;;  %s3715_s30 = smov [#allocation3]  }
  0x2d   :  { %s125_s0 = sshll.u32 %s3714_s29, 4  ;;  %s41_s5 = sshll.u32 %s3715_s30, 4  ;;  %s126_s0 = int_to_ptr.vmem [resolvable:$true] %s125_s0  ;;  %s42_s5 = int_to_ptr.vmem [resolvable:$true] %s41_s5 }
  0x2e   :  { %s3477_s18 = scalar_lea.vmem %s126_s0, 2048  ;;  %p3482_p2 = scmp.lt.s32.totalorder %s126_s0, %s126_s0 }
  0x2f   :  { %p3478_p1 = scmp.ne.s32.totalorder %s126_s0, %s3477_s18  ;;  %p3483_p3 = scmp.lt.s32.totalorder %s3477_s18, %s3477_s18 }
  0x31   :  { %p3484_p4 = por %p3483_p3, %p3482_p2 }
  0x33   :  { %p3485_p5 = pnand %p3484_p4, %p3478_p1 }
  0x35   :  { %3488 = shalt.err (!%p3485_p5)
}
  0x36   :  { %131 = dma.hbm_to_vmem [thread:$0]  %s4081_s9, 2048, %s126_s0, [#allocation16], %s3712_s21, %s3712_s21, %s3713_s22  }
  0x37   :  { %s3497_s7 = scalar_lea.vmem %s42_s5, 8192  ;;  %p3502_p7 = scmp.lt.s32.totalorder %s42_s5, %s42_s5 }
  0x38   :  { %p3498_p6 = scmp.ne.s32.totalorder %s42_s5, %s3497_s7  ;;  %p3503_p8 = scmp.lt.s32.totalorder %s3497_s7, %s3497_s7 }
  0x3a   :  { %p3504_p9 = por %p3503_p8, %p3502_p7 }
  0x3c   :  { %p3505_p10 = pnand %p3504_p9, %p3498_p6 }
  0x3e   :  { %3508 = shalt.err (!%p3505_p10)
}
  0x3f   :  { %47 = dma.hbm_to_vmem [thread:$0]  %s4074_s2, 8192, %s42_s5, [#allocation4], %s3712_s21, %s3712_s21, %s3713_s22  }
  0x40   :  { %s3716_s24 = smov [#allocation8]   ;;  %s3717_s25 = smov [#allocation11]  }
  0x41   :  { %s65_s3 = sshll.u32 %s3716_s24, 4  ;;  %s89_s9 = sshll.u32 %s3717_s25, 4  ;;  %s66_s3 = int_to_ptr.vmem [resolvable:$true] %s65_s3  ;;  %s90_s9 = int_to_ptr.vmem [resolvable:$true] %s89_s9 }
  0x42   :  { %s3517_s26 = scalar_lea.vmem %s66_s3, 2048  ;;  %p3522_p12 = scmp.lt.s32.totalorder %s66_s3, %s66_s3 }
  0x43   :  { %p3518_p11 = scmp.ne.s32.totalorder %s66_s3, %s3517_s26  ;;  %p3523_p13 = scmp.lt.s32.totalorder %s3517_s26, %s3517_s26 }
  0x45   :  { %p3524_p0 = por %p3523_p13, %p3522_p12 }
  0x47   :  { %p3525_p1 = pnand %p3524_p0, %p3518_p11 }
  0x49   :  { %3528 = shalt.err (!%p3525_p1)
}
  0x4a   :  { %71 = dma.hbm_to_vmem [thread:$0]  %s4076_s4, 2048, %s66_s3, [#allocation7], %s3708_s27, %s3708_s27, %s3709_s28  }
  0x4b   :  { %s3537_s2 = scalar_lea.vmem %s90_s9, 1024  ;;  %p3542_p3 = scmp.lt.s32.totalorder %s90_s9, %s90_s9 }
  0x4c   :  { %p3538_p2 = scmp.ne.s32.totalorder %s90_s9, %s3537_s2  ;;  %p3543_p4 = scmp.lt.s32.totalorder %s3537_s2, %s3537_s2 }
  0x4e   :  { %p3544_p5 = por %p3543_p4, %p3542_p3 }
  0x50   :  { %p3545_p6 = pnand %p3544_p5, %p3538_p2 }
  0x52   :  { %3548 = shalt.err (!%p3545_p6)
}
  0x53   :  { %95 = dma.hbm_to_vmem [thread:$0]  %s4078_s6, 1024, %s90_s9, [#allocation10], %s3708_s27, %s3708_s27, %s3709_s28  }
  0x54   :  { %s3718_s18 = smov [#allocation14]   ;;  %s3719_s20 = smov [#allocation17]  }
  0x55   :  { %s113_s19 = sshll.u32 %s3718_s18, 4  ;;  %s137_s4 = sshll.u32 %s3719_s20, 4  ;;  %s114_s19 = int_to_ptr.vmem [resolvable:$true] %s113_s19  ;;  %s138_s4 = int_to_ptr.vmem [resolvable:$true] %s137_s4 }
  0x56   :  { %s3557_s7 = scalar_lea.vmem %s114_s19, 1024  ;;  %p3562_p8 = scmp.lt.s32.totalorder %s114_s19, %s114_s19 }
  0x57   :  { %p3558_p7 = scmp.ne.s32.totalorder %s114_s19, %s3557_s7  ;;  %p3563_p9 = scmp.lt.s32.totalorder %s3557_s7, %s3557_s7 }
  0x59   :  { %p3564_p10 = por %p3563_p9, %p3562_p8 }
  0x5b   :  { %p3565_p11 = pnand %p3564_p10, %p3558_p7 }
  0x5d   :  { %3568 = shalt.err (!%p3565_p11)
}
  0x5e   :  { %119 = dma.hbm_to_vmem [thread:$0]  %s4080_s8, 1024, %s114_s19, [#allocation13], %s3708_s27, %s3708_s27, %s3709_s28  }
  0x5f   :  { %s3577_s6 = scalar_lea.vmem %s138_s4, 4096  ;;  %p3582_p13 = scmp.lt.s32.totalorder %s138_s4, %s138_s4 }
  0x60   :  { %p3578_p12 = scmp.ne.s32.totalorder %s138_s4, %s3577_s6  ;;  %p3583_p0 = scmp.lt.s32.totalorder %s3577_s6, %s3577_s6 }
  0x62   :  { %p3584_p1 = por %p3583_p0, %p3582_p13 }
  0x64   :  { %p3585_p2 = pnand %p3584_p1, %p3578_p12 }
  0x66   :  { %3588 = shalt.err (!%p3585_p2)
}
  0x67   :  { %143 = dma.hbm_to_vmem [thread:$0]  %s4082_s10, 4096, %s138_s4, [#allocation16], %s3712_s21, %s3712_s21, %s3713_s22  }
  0x68   :  { %s3720_s25 = smov [#allocation18]  }
  0x69   :  { %s149_s9 = sshll.u32 %s3720_s25, 4  ;;  %s150_s9 = int_to_ptr.vmem [resolvable:$true] %s149_s9 }
  0x6a   :  { %s3597_s26 = scalar_lea.vmem %s150_s9, 256  ;;  %p3602_p4 = scmp.lt.s32.totalorder %s150_s9, %s150_s9 }
  0x6b   :  { %p3598_p3 = scmp.ne.s32.totalorder %s150_s9, %s3597_s26  ;;  %p3603_p5 = scmp.lt.s32.totalorder %s3597_s26, %s3597_s26 }
  0x6d   :  { %p3604_p6 = por %p3603_p5, %p3602_p4 }
  0x6f   :  { %p3605_p7 = pnand %p3604_p6, %p3598_p3 }
  0x71   :  { %3608 = shalt.err (!%p3605_p7)
}
  0x72   :  { %155 = dma.hbm_to_vmem [thread:$0]  %s4083_s11, 256, %s150_s9, [#allocation19], %s3712_s21, %s3712_s21, %s3713_s22  }
  0x73   :  { %3689 = dma.done.wait [#allocation4], 8192  }
  0x74   :  { %3690 = vsyncadd [#allocation4], 4294959104 }
  0x75   :  { %3691 = dma.done.wait [#allocation7], 6144  }
  0x76   :  { %3692 = vsyncadd [#allocation7], 4294961152 }
  0x77   :  { %3693 = dma.done.wait [#allocation10], 3072  }
  0x78   :  { %3694 = vsyncadd [#allocation10], 4294964224 }
  0x79   :  { %3695 = dma.done.wait [#allocation13], 3072  }
  0x7a   :  { %3696 = vsyncadd [#allocation13], 4294964224 }
  0x7b   :  { %3697 = dma.done.wait [#allocation16], 6144  }
  0x7c   :  { %3698 = vsyncadd [#allocation16], 4294961152 }
  0x7d   :  { %3699 = dma.done.wait [#allocation19], 256  }
  0x7e   :  { %3700 = vsyncadd [#allocation19], 4294967040  ;;  %v3073_v0 = vld [vmem:[#allocation3 + $0x74] ss:$8 sps:$4 sm:$0xff]   ;;  %v3075_v1 = vld [vmem:[#allocation3 + $0x70] ss:$8 sps:$4 sm:$0xff]   ;;  %v282_v35 = vlaneseq }
  0x7f   :  { %459 = vmatprep.subr.bf16.mxu0 %v3073_v0  ;;  %v3076_v2 = vld [vmem:[#allocation3 + $0x64] ss:$8 sps:$4 sm:$0xff]   ;;  %v3078_v3 = vld [vmem:[#allocation3 + $0x60] ss:$8 sps:$4 sm:$0xff]   ;;  %v3079_v4 = vld [vmem:[#allocation3 + $0x54] ss:$8 sps:$4 sm:$0xff]  }
  0x80   :  { %460 = vmatpush1.bf16.msra.mxu0 %v3075_v1  ;;  %v3081_v5 = vld [vmem:[#allocation3 + $0x50] ss:$8 sps:$4 sm:$0xff]   ;;  %v3082_v6 = vld [vmem:[#allocation3 + $0x44] ss:$8 sps:$4 sm:$0xff]   ;;  %v3084_v7 = vld [vmem:[#allocation3 + $0x40] ss:$8 sps:$4 sm:$0xff]  }
  0x81   :  { %461 = vmatprep.subr.bf16.mxu0 %v3076_v2  ;;  %v3085_v8 = vld [vmem:[#allocation3 + $0x34] ss:$8 sps:$4 sm:$0xff]   ;;  %v3087_v9 = vld [vmem:[#allocation3 + $0x30] ss:$8 sps:$4 sm:$0xff]   ;;  %v3088_v10 = vld [vmem:[#allocation3 + $0x24] ss:$8 sps:$4 sm:$0xff]  }
  0x82   :  { %v3090_v11 = vld [vmem:[#allocation3 + $0x20] ss:$8 sps:$4 sm:$0xff]   ;;  %v3091_v12 = vld [vmem:[#allocation3 + $0x14] ss:$8 sps:$4 sm:$0xff]   ;;  %v3093_v13 = vld [vmem:[#allocation3 + $0x10] ss:$8 sps:$4 sm:$0xff]  }
  0x83   :  { %s4092_s28 = sld [smem:[#allocation35_spill]]  ;;  %v3094_v15 = vld [vmem:[#allocation3 + $0x4] ss:$8 sps:$4 sm:$0xff]   ;;  %v3096_v17 = vld [vmem:[#allocation3] ss:$8 sps:$4 sm:$0xff]   ;;  %v283_v36 = vshrl.u32 %v282_v35, 7 }
  0x84   :  { %462 = vmatpush1.bf16.msra.mxu0 %v3078_v3  ;;  %v3097_v18 = vld [vmem:[#allocation3 + $0xf4] ss:$8 sps:$4 sm:$0xff]   ;;  %v3099_v19 = vld [vmem:[#allocation3 + $0xf0] ss:$8 sps:$4 sm:$0xff]   ;;  %v3100_v20 = vld [vmem:[#allocation3 + $0xe4] ss:$8 sps:$4 sm:$0xff]  }
  0x85   :  { %463 = vmatprep.subr.bf16.mxu0 %v3079_v4  ;;  %v3102_v21 = vld [vmem:[#allocation3 + $0xe0] ss:$8 sps:$4 sm:$0xff]   ;;  %v3103_v22 = vld [vmem:[#allocation3 + $0xd4] ss:$8 sps:$4 sm:$0xff]   ;;  %v3105_v23 = vld [vmem:[#allocation3 + $0xd0] ss:$8 sps:$4 sm:$0xff]  }
  0x86   :  { %v3106_v24 = vld [vmem:[#allocation3 + $0xc4] ss:$8 sps:$4 sm:$0xff]   ;;  %v3108_v25 = vld [vmem:[#allocation3 + $0xc0] ss:$8 sps:$4 sm:$0xff]   ;;  %v3109_v26 = vld [vmem:[#allocation3 + $0xb4] ss:$8 sps:$4 sm:$0xff]  }
  0x87   :  { %v3111_v27 = vld [vmem:[#allocation3 + $0xb0] ss:$8 sps:$4 sm:$0xff]   ;;  %v3112_v28 = vld [vmem:[#allocation3 + $0xa4] ss:$8 sps:$4 sm:$0xff]   ;;  %v3114_v29 = vld [vmem:[#allocation3 + $0xa0] ss:$8 sps:$4 sm:$0xff]  }
  0x88   :  { %464 = vmatpush1.bf16.msra.mxu0 %v3081_v5  ;;  %v3115_v30 = vld [vmem:[#allocation3 + $0x94] ss:$8 sps:$4 sm:$0xff]   ;;  %v3117_v31 = vld [vmem:[#allocation3 + $0x90] ss:$8 sps:$4 sm:$0xff]   ;;  %v3118_v32 = vld [vmem:[#allocation3 + $0x84] ss:$8 sps:$4 sm:$0xff]  }
  0x89   :  { %465 = vmatprep.subr.bf16.mxu0 %v3082_v6  ;;  %v191_v14 = vld [vmem:[%s4092_s28] sm:$0xff]  ;;  %v3881_v37 = vsub.s32 0, %v283_v36  ;;  %v3883_v38 = vsub.s32 1, %v283_v36  ;;  %v3123_v56 = vld [vmem:[#allocation3 + $0x170] ss:$8 sps:$4 sm:$0xff]   ;;  %v3154_v3 = vld [vmem:[#allocation6 + $0x68] sm:$0xff]  }
  0x8a   :  { %v2637_v16 = vcombine.high %v191_v14, %v191_v14  ;;  %v3120_v33 = vld [vmem:[#allocation3 + $0x80] ss:$8 sps:$4 sm:$0xff]   ;;  %v2636_v34 = vcombine.low %v191_v14, %v191_v14  ;;  %v3125_v57 = vld [vmem:[#allocation3 + $0x174] ss:$8 sps:$4 sm:$0xff]   ;;  %v3128_v58 = vld [vmem:[#allocation3 + $0x164] ss:$8 sps:$4 sm:$0xff]  }
  0x8b   :  { %v272_v39 = vld [vmem:[%s4084_s12] ss:$8 sm:$0x3]  ;;  %v3131_v60 = vld [vmem:[#allocation3 + $0x154] ss:$8 sps:$4 sm:$0xff]   ;;  %s4093_s2 = sld [smem:[#allocation36_spill]] }
  0x8c   :  { %466 = vmatpush1.bf16.msra.mxu0 %v3084_v7  ;;  %491 = vmatprep.mubr.bf16.mxu0 %v2637_v16  ;;  %v285_v40 = vrot.slane %v272_v39, %v3881_v37  ;;  %v289_v41 = vrot.slane %v272_v39, %v3883_v38  ;;  %v3126_v59 = vld [vmem:[#allocation3 + $0x160] ss:$8 sps:$4 sm:$0xff]   ;;  %v3144_v61 = vld [vmem:[#allocation6 + $0x78] sm:$0xff]   ;;  %v3149_v63 = vld [vmem:[#allocation6 + $0x70] sm:$0xff]   ;;  %vm3722_vm0 = vmmov 0  }
  0x8d   :  { %467 = vmatprep.subr.bf16.mxu0 %v3085_v8  ;;  %v3148_v62 = vld [vmem:[#allocation6 + $0x38] sm:$0xff]   ;;  %2870 = vmatprep.subr.bf16.mxu1 %v3144_v61  ;;  %v3153_v1 = vld [vmem:[#allocation6 + $0x30] sm:$0xff]   ;;  %v3134_v2 = vld [vmem:[#allocation3 + $0x144] ss:$8 sps:$4 sm:$0xff]  }
  0x8e   :  { %v3129_v0 = vld [vmem:[#allocation3 + $0x150] ss:$8 sps:$4 sm:$0xff]   ;;  %2871 = vmatpush3.bf16.msra.mxu1 %v3148_v62  ;;  %v3132_v4 = vld [vmem:[#allocation3 + $0x140] ss:$8 sps:$4 sm:$0xff]   ;;  %v3137_v6 = vld [vmem:[#allocation3 + $0x134] ss:$8 sps:$4 sm:$0xff]  }
  0x8f   :  { %2872 = vmatprep.subr.bf16.mxu1 %v3149_v63  ;;  %v3158_v5 = vld [vmem:[#allocation6 + $0x28] sm:$0xff]   ;;  %v3159_v7 = vld [vmem:[#allocation6 + $0x60] sm:$0xff]   ;;  %v3135_v8 = vld [vmem:[#allocation3 + $0x130] ss:$8 sps:$4 sm:$0xff]  }
  0x90   :  { %468 = vmatpush1.bf16.msra.mxu0 %v3087_v9  ;;  %v3163_v9 = vld [vmem:[#allocation6 + $0x20] sm:$0xff]   ;;  %v3143_v14 = vld [vmem:[#allocation3 + $0x114] ss:$8 sps:$4 sm:$0xff]   ;;  %v3141_v16 = vld [vmem:[#allocation3 + $0x110] ss:$8 sps:$4 sm:$0xff]  }
  0x91   :  { %469 = vmatprep.subr.bf16.mxu0 %v3088_v10  ;;  %v3140_v10 = vld [vmem:[#allocation3 + $0x124] ss:$8 sps:$4 sm:$0xff]   ;;  %v3175_v35 = vld [vmem:[#allocation3 + $0x1a0] ss:$8 sps:$4 sm:$0xff]   ;;  %v3182_v36 = vld [vmem:[#allocation3 + $0x194] ss:$8 sps:$4 sm:$0xff]  }
  0x92   :  { %2873 = vmatpush3.bf16.msra.mxu1 %v3153_v1  ;;  %v3180_v39 = vld [vmem:[#allocation3 + $0x190] ss:$8 sps:$4 sm:$0xff]  }
  0x93   :  { %2874 = vmatprep.subr.bf16.mxu1 %v3154_v3 }
  0x94   :  { %470 = vmatpush1.bf16.msra.mxu0 %v3090_v11  ;;  %v3164_v11 = vld [vmem:[#allocation6 + $0x58] sm:$0xff]  }
  0x95   :  { %471 = vmatprep.subr.bf16.mxu0 %v3091_v12  ;;  %v3138_v12 = vld [vmem:[#allocation3 + $0x120] ss:$8 sps:$4 sm:$0xff]  }
  0x96   :  { %2875 = vmatpush3.bf16.msra.mxu1 %v3158_v5 }
  0x97   :  { %2876 = vmatprep.subr.bf16.mxu1 %v3159_v7 }
  0x98   :  { %472 = vmatpush1.bf16.msra.mxu0 %v3093_v13  ;;  %v3168_v13 = vld [vmem:[#allocation6 + $0x18] sm:$0xff]  }
  0x99   :  { %473 = vmatprep.subr.bf16.mxu0 %v3094_v15  ;;  %v3169_v15 = vld [vmem:[#allocation6 + $0x50] sm:$0xff]  }
  0x9a   :  { %2877 = vmatpush3.bf16.msra.mxu1 %v3163_v9 }
  0x9b   :  { %2878 = vmatprep.subr.bf16.mxu1 %v3164_v11 }
  0x9c   :  { %474 = vmatpush1.bf16.msra.mxu0 %v3096_v17  ;;  %v3173_v17 = vld [vmem:[#allocation6 + $0x10] sm:$0xff]  }
  0x9d   :  { %475 = vmatprep.subr.bf16.mxu0 %v3097_v18  ;;  %v3147_v18 = vld [vmem:[#allocation3 + $0x104] ss:$8 sps:$4 sm:$0xff]  }
  0x9e   :  { %2879 = vmatpush3.bf16.msra.mxu1 %v3168_v13 }
  0x9f   :  { %2880 = vmatprep.subr.bf16.mxu1 %v3169_v15 }
  0xa0   :  { %476 = vmatpush2.bf16.msra.mxu0 %v3099_v19  ;;  %v3174_v19 = vld [vmem:[#allocation6 + $0x48] sm:$0xff]  }
  0xa1   :  { %477 = vmatprep.subr.bf16.mxu0 %v3100_v20  ;;  %v3145_v20 = vld [vmem:[#allocation3 + $0x100] ss:$8 sps:$4 sm:$0xff]  }
  0xa2   :  { %2881 = vmatpush3.bf16.msra.mxu1 %v3173_v17 }
  0xa3   :  { %2882 = vmatprep.subr.bf16.mxu1 %v3174_v19 }
  0xa4   :  { %478 = vmatpush2.bf16.msra.mxu0 %v3102_v21  ;;  %v3178_v21 = vld [vmem:[#allocation6 + $0x8] sm:$0xff]  }
  0xa5   :  { %479 = vmatprep.subr.bf16.mxu0 %v3103_v22  ;;  %v3152_v22 = vld [vmem:[#allocation3 + $0x1f4] ss:$8 sps:$4 sm:$0xff]  }
  0xa6   :  { %2883 = vmatpush3.bf16.msra.mxu1 %v3178_v21  ;;  %v2698_v21 = vld [vmem:[%s4084_s12 + $0x3] ss:$8 sm:$0x3] }
  0xa8   :  { %480 = vmatpush2.bf16.msra.mxu0 %v3105_v23  ;;  %v3179_v23 = vld [vmem:[#allocation6 + $0x40] sm:$0xff]  }
  0xa9   :  { %481 = vmatprep.subr.bf16.mxu0 %v3106_v24  ;;  %v3150_v24 = vld [vmem:[#allocation3 + $0x1f0] ss:$8 sps:$4 sm:$0xff]   ;;  %2884 = vmatprep.subr.bf16.mxu1 %v3179_v23  ;;  %v929_v23 = vrot.slane %v2698_v21, %v3883_v38 }
  0xac   :  { %482 = vmatpush2.bf16.msra.mxu0 %v3108_v25  ;;  %v3183_v25 = vld [vmem:[#allocation6] sm:$0xff]  }
  0xad   :  { %483 = vmatprep.subr.bf16.mxu0 %v3109_v26  ;;  %v3157_v26 = vld [vmem:[#allocation3 + $0x1e4] ss:$8 sps:$4 sm:$0xff]   ;;  %2885 = vmatpush3.bf16.msra.mxu1 %v3183_v25 }
  0xb0   :  { %484 = vmatpush2.bf16.msra.mxu0 %v3111_v27  ;;  %v3155_v27 = vld [vmem:[#allocation3 + $0x1e0] ss:$8 sps:$4 sm:$0xff]  }
  0xb1   :  { %485 = vmatprep.subr.bf16.mxu0 %v3112_v28  ;;  %v3162_v28 = vld [vmem:[#allocation3 + $0x1d4] ss:$8 sps:$4 sm:$0xff]  }
  0xb4   :  { %486 = vmatpush2.bf16.msra.mxu0 %v3114_v29  ;;  %v3160_v29 = vld [vmem:[#allocation3 + $0x1d0] ss:$8 sps:$4 sm:$0xff]  }
  0xb5   :  { %487 = vmatprep.subr.bf16.mxu0 %v3115_v30  ;;  %v3167_v30 = vld [vmem:[#allocation3 + $0x1c4] ss:$8 sps:$4 sm:$0xff]  }
  0xb8   :  { %488 = vmatpush2.bf16.msra.mxu0 %v3117_v31  ;;  %v3165_v31 = vld [vmem:[#allocation3 + $0x1c0] ss:$8 sps:$4 sm:$0xff]  }
  0xb9   :  { %489 = vmatprep.subr.bf16.mxu0 %v3118_v32  ;;  %v3172_v32 = vld [vmem:[#allocation3 + $0x1b4] ss:$8 sps:$4 sm:$0xff]  }
  0xbc   :  { %490 = vmatpush2.bf16.msra.mxu0 %v3120_v33  ;;  %v3170_v33 = vld [vmem:[#allocation3 + $0x1b0] ss:$8 sps:$4 sm:$0xff]  }
  0xbd   :  { %1099 = vmatprep.subr.bf16.mxu0 %v3125_v57 }
  0xbf   :  { %492 = vmatmul.mubr.bf16.vlgmr.msra.gmra.mxu0 %v2636_v34  ;;  %v3177_v34 = vld [vmem:[#allocation3 + $0x1a4] ss:$8 sps:$4 sm:$0xff]  }
  0xc0   :  { %1100 = vmatpush1.bf16.msra.mxu0 %v3123_v56 }
  0xc1   :  { %1101 = vmatprep.subr.bf16.mxu0 %v3128_v58 }
  0xc4   :  { %1102 = vmatpush1.bf16.msra.mxu0 %v3126_v59 }
  0xc5   :  { %1103 = vmatprep.subr.bf16.mxu0 %v3131_v60 }
  0xc8   :  { %1104 = vmatpush1.bf16.msra.mxu0 %v3129_v0 }
  0xc9   :  { %1105 = vmatprep.subr.bf16.mxu0 %v3134_v2 }
  0xcc   :  { %1106 = vmatpush1.bf16.msra.mxu0 %v3132_v4 }
  0xcd   :  { %1107 = vmatprep.subr.bf16.mxu0 %v3137_v6 }
  0xd0   :  { %1108 = vmatpush1.bf16.msra.mxu0 %v3135_v8 }
  0xd1   :  { %1109 = vmatprep.subr.bf16.mxu0 %v3140_v10 }
  0xd4   :  { %1110 = vmatpush1.bf16.msra.mxu0 %v3138_v12 }
  0xd5   :  { %1111 = vmatprep.subr.bf16.mxu0 %v3143_v14 }
  0xd8   :  { %1112 = vmatpush1.bf16.msra.mxu0 %v3141_v16 }
  0xd9   :  { %1113 = vmatprep.subr.bf16.mxu0 %v3147_v18 }
  0xdc   :  { %1114 = vmatpush1.bf16.msra.mxu0 %v3145_v20 }
  0xdd   :  { %1115 = vmatprep.subr.bf16.mxu0 %v3152_v22  ;;  %v925_v22 = vrot.slane %v2698_v21, %v3881_v37 }
  0xe0   :  { %1116 = vmatpush2.bf16.msra.mxu0 %v3150_v24 }
  0xe1   :  { %1117 = vmatprep.subr.bf16.mxu0 %v3157_v26  ;;  %v2670_v26 = vld [vmem:[#allocation18] ss:$0 sm:$0xff] }
  0xe4   :  { %1118 = vmatpush2.bf16.msra.mxu0 %v3155_v27 }
  0xe5   :  { %1119 = vmatprep.subr.bf16.mxu0 %v3162_v28 }
  0xe8   :  { %1120 = vmatpush2.bf16.msra.mxu0 %v3160_v29 }
  0xe9   :  { %1121 = vmatprep.subr.bf16.mxu0 %v3167_v30 }
  0xec   :  { %1122 = vmatpush2.bf16.msra.mxu0 %v3165_v31 }
  0xed   :  { %1123 = vmatprep.subr.bf16.mxu0 %v3172_v32 }
  0xf0   :  { %1124 = vmatpush2.bf16.msra.mxu0 %v3170_v33 }
  0xf1   :  { %1125 = vmatprep.subr.bf16.mxu0 %v3177_v34 }
  0xf4   :  { %1126 = vmatpush2.bf16.msra.mxu0 %v3175_v35 }
  0xf5   :  { %1127 = vmatprep.subr.bf16.mxu0 %v3182_v36 }
  0xf8   :  { %1128 = vmatpush2.bf16.msra.mxu0 %v3180_v39 }
 0x17f   :  { %v493_v42 = vpop.f32.mrf.mxu0 }
 0x180   :  { %v494_v44 = vadd.f32 %v493_v42, %v285_v40  ;;  %v3186_v40 = vld [vmem:[#allocation3 + $0x184] ss:$8 sps:$4 sm:$0xff]  }
 0x181   :  { %v495_v43 = vpop.f32.mrf.mxu0  ;;  %v827_v42 = vld [vmem:[%s4093_s2] sm:$0xff]  ;;  %1129 = vmatprep.subr.bf16.mxu0 %v3186_v40 }
 0x182   :  { %v496_v45 = vadd.f32 %v495_v43, %v289_v41  ;;  %v3184_v41 = vld [vmem:[#allocation3 + $0x180] ss:$8 sps:$4 sm:$0xff]   ;;  %v2701_v43 = vcombine.low %v827_v42, %v827_v42 }
 0x183   :  { %v497_v46 = vpop.f32.mrf.mxu0  ;;  %1130 = vmatpush2.bf16.msra.mxu0 %v3184_v41 }
 0x184   :  { %v500_v47 = vadd.f32 %v496_v45, %v494_v44 }
 0x185   :  { %v498_v48 = vpop.f32.mrf.mxu0 }
 0x186   :  { %501 = vadd.xlane.f32.xlu0 %v500_v47  ;;  %v2634_v48 = vld [vmem:[%s4084_s12 + $0x1] ss:$8 sm:$0x3] }
 0x20f   :  { %v502_v49 = vpop.xlane.xlu0 %501 }
 0x210   :  { %v504_v50 = vmul.f32 0.00390625, %v502_v49  ;;  %v2635_v49 = vld [vmem:[%s4084_s12 + $0x2] ss:$8 sm:$0x3] }
 0x211   :  { %v534_v56 = vrot.slane %v2635_v49, %v3881_v37  ;;  %v538_v57 = vrot.slane %v2635_v49, %v3883_v38  ;;  %v3190_v49 = vld [vmem:[#allocation8 + $0x30] sm:$0xff]  }
 0x212   :  { %v3890_v51 = vsub.f32 %v494_v44, %v504_v50  ;;  %v3892_v52 = vsub.f32 %v496_v45, %v504_v50  ;;  %v2702_v44 = vcombine.high %v827_v42, %v827_v42  ;;  %v521_v50 = vrot.slane %v2634_v48, %v3881_v37 }
 0x214   :  { %v507_v53 = vmul.f32 %v3890_v51, %v3890_v51  ;;  %v508_v54 = vmul.f32 %v3892_v52, %v3892_v52  ;;  %1131 = vmatprep.mubr.bf16.mxu0 %v2702_v44 }
 0x215   :  { %1132 = vmatmul.mubr.bf16.vlgmr.msra.gmra.mxu0 %v2701_v43 }
 0x216   :  { %v509_v55 = vadd.f32 %v508_v54, %v507_v53  ;;  %v525_v53 = vrot.slane %v2634_v48, %v3883_v38  ;;  %v3721_v48 = vmov 0.0  }
 0x217   :  { %2972 = vmatprep.subr.bf16.mxu1 %v3721_v48 }
 0x218   :  { %510 = vadd.xlane.f32.xlu0 %v509_v55 }
 0x2a1   :  { %v511_v45 = vpop.xlane.xlu0 %510 }
 0x2a2   :  { %v512_v46 = vmul.f32 0.00390625, %v511_v45 }
 0x2a4   :  { %v513_v47 = vadd.f32 1e-05, %v512_v46 }
 0x2a6   :  { %3349 = vrsqrt.f32 %v513_v47  ;;  %v3189_v47 = vld [vmem:[#allocation8 + $0x38] sm:$0xff]  }
 0x2b3   :  { %v3350_v54 = vpop.eup %3349 }
 0x2b4   :  { %v516_v55 = vmul.f32 %v3350_v54, %v3892_v52  ;;  %v515_v58 = vmul.f32 %v3350_v54, %v3890_v51  ;;  %v3193_v54 = vld [vmem:[#allocation8 + $0x18] sm:$0xff]  }
 0x2b6   :  { %v529_v59 = vmul.f32 %v525_v53, %v516_v55  ;;  %v528_v60 = vmul.f32 %v521_v50, %v515_v58  ;;  %v3191_v50 = vld [vmem:[#allocation8 + $0x28] sm:$0xff]   ;;  %v3192_v53 = vld [vmem:[#allocation8 + $0x20] sm:$0xff]   ;;  %v3194_v55 = vld [vmem:[#allocation8 + $0x10] sm:$0xff]  }
 0x2b7   :  { %v3197_v58 = vld [vmem:[#allocation6 + $0xf8] sm:$0xff]  }
 0x2b8   :  { %v542_v61 = vadd.f32 %v538_v57, %v529_v59  ;;  %v541_v62 = vadd.f32 %v534_v56, %v528_v60  ;;  %v3195_v56 = vld [vmem:[#allocation8 + $0x8] sm:$0xff]   ;;  %v3196_v57 = vld [vmem:[#allocation8] sm:$0xff]   ;;  %v3213_v59 = vld [vmem:[#allocation9 + $0x70] ss:$8 sps:$4 sm:$0xff]  }
 0x2b9   :  { %v3215_v60 = vld [vmem:[#allocation9 + $0x74] ss:$8 sps:$4 sm:$0xff]  }
 0x2ba   :  { %v544_v63 = vmin.f32 %v542_v61, 20.0  ;;  %v543_v0 = vmin.f32 %v541_v62, 20.0  ;;  %1574 = vmatprep.subr.bf16.mxu0 %v3215_v60 }
 0x2bb   :  { %1575 = vmatpush1.bf16.msra.mxu0 %v3213_v59 }
 0x2bc   :  { %v547_v1 = vmul.f32 1.442695, %v544_v63  ;;  %v545_v2 = vmul.f32 1.442695, %v543_v0  ;;  %v3221_v63 = vld [vmem:[#allocation9 + $0x54] ss:$8 sps:$4 sm:$0xff]  }
 0x2bd   :  { %v3219_v0 = vld [vmem:[#allocation9 + $0x50] ss:$8 sps:$4 sm:$0xff]  }
 0x2be   :  { %3351 = vpow2.f32 %v547_v1  ;;  %v3224_v1 = vld [vmem:[#allocation9 + $0x44] ss:$8 sps:$4 sm:$0xff]  }
 0x2bf   :  { %3353 = vpow2.f32 %v545_v2  ;;  %v3222_v2 = vld [vmem:[#allocation9 + $0x40] ss:$8 sps:$4 sm:$0xff]  }
 0x2cb   :  { %v3352_v3 = vpop.eup %3351 }
 0x2cc   :  { %v3354_v4 = vpop.eup %3353  ;;  %v550_v5 = vadd.f32 2.0, %v3352_v3 }
 0x2cd   :  { %v549_v52 = vadd.f32 2.0, %v3354_v4 }
 0x2ce   :  { %v552_v6 = vmul.f32 %v3352_v3, %v550_v5  ;;  %v3227_v3 = vld [vmem:[#allocation9 + $0x34] ss:$8 sps:$4 sm:$0xff]   ;;  %v3230_v5 = vld [vmem:[#allocation9 + $0x24] ss:$8 sps:$4 sm:$0xff]  }
 0x2cf   :  { %v551_v7 = vmul.f32 %v3354_v4, %v549_v52  ;;  %v3225_v4 = vld [vmem:[#allocation9 + $0x30] ss:$8 sps:$4 sm:$0xff]   ;;  %v3228_v52 = vld [vmem:[#allocation9 + $0x20] ss:$8 sps:$4 sm:$0xff]  }
 0x2d0   :  { %v556_v8 = vadd.f32 2.0, %v552_v6  ;;  %v554_v51 = vmul.f32 %v552_v6, %v542_v61  ;;  %v3218_v61 = vld [vmem:[#allocation9 + $0x64] ss:$8 sps:$4 sm:$0xff]   ;;  %v3233_v6 = vld [vmem:[#allocation9 + $0x14] ss:$8 sps:$4 sm:$0xff]  }
 0x2d1   :  { %v555_v9 = vadd.f32 2.0, %v551_v7  ;;  %v553_v11 = vmul.f32 %v551_v7, %v541_v62  ;;  %v3216_v62 = vld [vmem:[#allocation9 + $0x60] ss:$8 sps:$4 sm:$0xff]   ;;  %1576 = vmatprep.subr.bf16.mxu0 %v3218_v61  ;;  %v3231_v7 = vld [vmem:[#allocation9 + $0x10] ss:$8 sps:$4 sm:$0xff]  }
 0x2d2   :  { %3355 = vrcp.f32 %v556_v8  ;;  %1577 = vmatpush1.bf16.msra.mxu0 %v3216_v62  ;;  %v3200_v61 = vld [vmem:[#allocation6 + $0xb0] sm:$0xff]  }
 0x2d3   :  { %3357 = vrcp.f32 %v555_v9  ;;  %1578 = vmatprep.subr.bf16.mxu0 %v3221_v63  ;;  %v3201_v63 = vld [vmem:[#allocation6 + $0xe8] sm:$0xff]  }
 0x2d5   :  { %v1133_v17 = vpop.f32.mrf.mxu0 }
 0x2d6   :  { %v1134_v28 = vadd.f32 %v1133_v17, %v925_v22  ;;  %1579 = vmatpush1.bf16.msra.mxu0 %v3219_v0  ;;  %v2699_v17 = vld [vmem:[%s4084_s12 + $0x4] ss:$8 sm:$0x3] }
 0x2d7   :  { %v1135_v18 = vpop.f32.mrf.mxu0  ;;  %1580 = vmatprep.subr.bf16.mxu0 %v3224_v1  ;;  %v1164_v21 = vrot.slane %v2699_v17, %v3883_v38 }
 0x2d8   :  { %v1136_v29 = vadd.f32 %v1135_v18, %v929_v23 }
 0x2d9   :  { %v1137_v19 = vpop.f32.mrf.mxu0 }
 0x2da   :  { %v1140_v33 = vadd.f32 %v1136_v29, %v1134_v28  ;;  %1581 = vmatpush1.bf16.msra.mxu0 %v3222_v2  ;;  %v2700_v19 = vld [vmem:[%s4084_s12 + $0x5] ss:$8 sm:$0x3] }
 0x2db   :  { %v1138_v20 = vpop.f32.mrf.mxu0  ;;  %1582 = vmatprep.subr.bf16.mxu0 %v3227_v3  ;;  %v3202_v2 = vld [vmem:[#allocation6 + $0xa8] sm:$0xff]   ;;  %v3203_v3 = vld [vmem:[#allocation6 + $0xe0] sm:$0xff]  }
 0x2de   :  { %1583 = vmatpush1.bf16.msra.mxu0 %v3225_v4 }
 0x2df   :  { %v3356_v10 = vpop.eup %3355  ;;  %1584 = vmatprep.subr.bf16.mxu0 %v3230_v5  ;;  %v3204_v5 = vld [vmem:[#allocation6 + $0xa0] sm:$0xff]  }
 0x2e0   :  { %v3358_v12 = vpop.eup %3357  ;;  %v560_v13 = vmul.f32 %v3356_v10, %v554_v51 }
 0x2e1   :  { %v559_v14 = vmul.f32 %v3358_v12, %v553_v11 }
 0x2e2   :  { %v562_v15 = vpack.c.bf16 %v560_v13, %v560_v13  ;;  %1585 = vmatpush1.bf16.msra.mxu0 %v3228_v52  ;;  %v3205_v52 = vld [vmem:[#allocation6 + $0xd8] sm:$0xff]  }
 0x2e3   :  { %v561_v16 = vpack.c.bf16 %v559_v14, %v559_v14  ;;  %1586 = vmatprep.subr.bf16.mxu0 %v3233_v6  ;;  %v2687_v14 = vld [vmem:[#allocation18 + $0x1] ss:$0 sm:$0xff]  ;;  %v3206_v6 = vld [vmem:[#allocation6 + $0x98] sm:$0xff]  }
 0x2e4   :  { %695 = vmatprep.mubr.bf16.mxu1 %v562_v15 }
 0x2e5   :  { %696 = vmatmul.mubr.bf16.vlgmr.msra.gmra.mxu1 %v561_v16  ;;  %v2688_v16 = vld [vmem:[#allocation18 + $0x2] ss:$0 sm:$0xff] }
 0x2e6   :  { %2988 = vmatprep.mubr.msk.bf16.mxu1 %vm3722_vm0, %v3721_v48  ;;  %2973 = vmatpush3.bf16.msra.mxu1 %v3189_v47 }
 0x2e7   :  { %2974 = vmatprep.subr.bf16.mxu1 %v3721_v48  ;;  %1587 = vmatpush1.bf16.msra.mxu0 %v3231_v7  ;;  %v3207_v7 = vld [vmem:[#allocation6 + $0xd0] sm:$0xff]  }
 0x2ea   :  { %2975 = vmatpush3.bf16.msra.mxu1 %v3190_v49 }
 0x2eb   :  { %2976 = vmatprep.subr.bf16.mxu1 %v3721_v48 }
 0x2ee   :  { %2977 = vmatpush3.bf16.msra.mxu1 %v3191_v50 }
 0x2ef   :  { %2978 = vmatprep.subr.bf16.mxu1 %v3721_v48 }
 0x2f2   :  { %2979 = vmatpush3.bf16.msra.mxu1 %v3192_v53 }
 0x2f3   :  { %2980 = vmatprep.subr.bf16.mxu1 %v3721_v48 }
 0x2f6   :  { %2981 = vmatpush3.bf16.msra.mxu1 %v3193_v54 }
 0x2f7   :  { %2982 = vmatprep.subr.bf16.mxu1 %v3721_v48 }
 0x2fa   :  { %2983 = vmatpush3.bf16.msra.mxu1 %v3194_v55  ;;  %v3198_v55 = vld [vmem:[#allocation6 + $0xb8] sm:$0xff]  }
 0x2fb   :  { %2984 = vmatprep.subr.bf16.mxu1 %v3721_v48 }
 0x2fe   :  { %2985 = vmatpush3.bf16.msra.mxu1 %v3195_v56 }
 0x2ff   :  { %2986 = vmatprep.subr.bf16.mxu1 %v3721_v48 }
 0x302   :  { %2987 = vmatpush3.bf16.msra.mxu1 %v3196_v57  ;;  %v3199_v57 = vld [vmem:[#allocation6 + $0xf0] sm:$0xff]  }
 0x303   :  { %2901 = vmatprep.subr.bf16.mxu1 %v3197_v58 }
 0x3a5   :  { %v2886_v24 = vpop.f32.mrf.mxu1 }
 0x3a7   :  { %v2887_v25 = vpop.f32.mrf.mxu1 }
 0x3a8   :  { %v2888_v27 = vadd.f32 %v2887_v25, %v2886_v24  ;;  %v1177_v25 = vrot.slane %v2700_v19, %v3883_v38 }
 0x3a9   :  { %v2889_v30 = vpop.f32.mrf.mxu1 }
 0x3aa   :  { %v698_v31 = vadd.f32 %v2888_v27, %v2670_v26 }
 0x3ab   :  { %v2890_v32 = vpop.f32.mrf.mxu1 }
 0x3ac   :  { %703 = vadd.xlane.f32.xlu1 %v698_v31  ;;  %v1173_v32 = vrot.slane %v2700_v19, %v3881_v37  ;;  %v2689_v19 = vld [vmem:[#allocation18 + $0x3] ss:$0 sm:$0xff] }
 0x3b0   :  { %1141 = vadd.xlane.f32.xlu1 %v1140_v33 }
 0x435   :  { %v704_v34 = vpop.xlane.xlu1 %703 }
 0x436   :  { %v706_v35 = vmul.f32 0.0078125, %v704_v34 }
 0x438   :  { %v3918_v36 = vsub.f32 %v698_v31, %v706_v35 }
 0x439   :  { %v1142_v39 = vpop.xlane.xlu1 %1141 }
 0x43a   :  { %v1143_v40 = vmul.f32 0.00390625, %v1142_v39  ;;  %v708_v41 = vmul.f32 %v3918_v36, %v3918_v36 }
 0x43c   :  { %v3922_v42 = vsub.f32 %v1134_v28, %v1143_v40  ;;  %v3924_v43 = vsub.f32 %v1136_v29, %v1143_v40  ;;  %709 = vadd.xlane.f32.xlu0 %v708_v41  ;;  %v1160_v29 = vrot.slane %v2699_v17, %v3881_v37  ;;  %v3234_v17 = vld [vmem:[#allocation9] ss:$8 sps:$4 sm:$0xff]  }
 0x43e   :  { %v1146_v44 = vmul.f32 %v3922_v42, %v3922_v42  ;;  %v1147_v45 = vmul.f32 %v3924_v43, %v3924_v43 }
 0x440   :  { %v1148_v46 = vadd.f32 %v1147_v45, %v1146_v44 }
 0x442   :  { %1149 = vadd.xlane.f32.xlu1 %v1148_v46 }
 0x4c5   :  { %v710_v8 = vpop.xlane.xlu0 %709 }
 0x4c6   :  { %v711_v9 = vmul.f32 0.0078125, %v710_v8  ;;  %v3208_v8 = vld [vmem:[#allocation6 + $0x90] sm:$0xff]  }
 0x4c8   :  { %v712_v51 = vadd.f32 1e-05, %v711_v9  ;;  %v3209_v9 = vld [vmem:[#allocation6 + $0xc8] sm:$0xff]  }
 0x4ca   :  { %3359 = vrsqrt.f32 %v712_v51  ;;  %v3210_v51 = vld [vmem:[#allocation6 + $0x88] sm:$0xff]  }
 0x4cb   :  { %v1150_v10 = vpop.xlane.xlu1 %1149 }
 0x4cc   :  { %v1151_v11 = vmul.f32 0.00390625, %v1150_v10  ;;  %v3211_v10 = vld [vmem:[#allocation6 + $0xc0] sm:$0xff]  }
 0x4ce   :  { %v1152_v12 = vadd.f32 1e-05, %v1151_v11 }
 0x4d0   :  { %3361 = vrsqrt.f32 %v1152_v12 }
 0x4d7   :  { %v3360_v13 = vpop.eup %3359 }
 0x4d8   :  { %v714_v15 = vmul.f32 %v3360_v13, %v3918_v36  ;;  %v3212_v13 = vld [vmem:[#allocation6 + $0x80] sm:$0xff]  }
 0x4da   :  { %v719_v18 = vmul.f32 %v2687_v14, %v714_v15 }
 0x4dc   :  { %v724_v20 = vadd.f32 %v2688_v16, %v719_v18  ;;  %v3236_v16 = vld [vmem:[#allocation9 + $0x4] ss:$8 sps:$4 sm:$0xff]   ;;  %v3723_v18 = vmov 0  }
 0x4dd   :  { %v3362_v22 = vpop.eup %3361  ;;  %1588 = vmatprep.subr.bf16.mxu0 %v3236_v16  ;;  %1606 = vmatprep.mubr.bf16.mxu0 %v3723_v18 }
 0x4de   :  { %v725_v23 = vmin.f32 %v724_v20, 20.0  ;;  %v1155_v24 = vmul.f32 %v3362_v22, %v3924_v43  ;;  %v1154_v28 = vmul.f32 %v3362_v22, %v3922_v42  ;;  %1589 = vmatpush1.bf16.msra.mxu0 %v3234_v17 }
 0x4df   :  { %3012 = vmatprep.subr.bf16.mxu0 %v3721_v48 }
 0x4e0   :  { %v726_v26 = vmul.f32 1.442695, %v725_v23  ;;  %v1168_v27 = vmul.f32 %v1164_v21, %v1155_v24  ;;  %v1167_v33 = vmul.f32 %v1160_v29, %v1154_v28  ;;  %v2735_v28 = vld [vmem:[#allocation18 + $0x4] ss:$0 sm:$0xff] }
 0x4e2   :  { %3363 = vpow2.f32 %v726_v26  ;;  %v1181_v30 = vadd.f32 %v1177_v25, %v1168_v27  ;;  %v1180_v35 = vadd.f32 %v1173_v32, %v1167_v33 }
 0x4e4   :  { %v1183_v31 = vmin.f32 %v1181_v30, 20.0  ;;  %v1182_v36 = vmin.f32 %v1180_v35, 20.0 }
 0x4e6   :  { %v1186_v34 = vmul.f32 1.442695, %v1183_v31  ;;  %v1184_v41 = vmul.f32 1.442695, %v1182_v36 }
 0x4e8   :  { %3365 = vpow2.f32 %v1186_v34 }
 0x4e9   :  { %3367 = vpow2.f32 %v1184_v41 }
 0x4ef   :  { %v3364_v39 = vpop.eup %3363 }
 0x4f0   :  { %v728_v40 = vadd.f32 2.0, %v3364_v39 }
 0x4f2   :  { %v729_v43 = vmul.f32 %v3364_v39, %v728_v40  ;;  %v1482_v39 = vld [vmem:[%s4085_s13] ss:$2 sm:$0x3] }
 0x4f3   :  { %v1487_v40 = vrot.slane %v1482_v39, %v3881_v37  ;;  %v1491_v41 = vrot.slane %v1482_v39, %v3883_v38  ;;  %v3260_v39 = vld [vmem:[#allocation12] sm:$0xff]  }
 0x4f4   :  { %v731_v44 = vadd.f32 2.0, %v729_v43  ;;  %v730_v50 = vmul.f32 %v729_v43, %v724_v20 }
 0x4f5   :  { %v3366_v45 = vpop.eup %3365 }
 0x4f6   :  { %3369 = vrcp.f32 %v731_v44  ;;  %v1189_v42 = vadd.f32 2.0, %v3366_v45  ;;  %v3368_v49 = vpop.eup %3367 }
 0x4f7   :  { %v1188_v58 = vadd.f32 2.0, %v3368_v49 }
 0x4f8   :  { %v1191_v46 = vmul.f32 %v3366_v45, %v1189_v42 }
 0x4f9   :  { %v1190_v0 = vmul.f32 %v3368_v49, %v1188_v58  ;;  %v3237_v49 = vld [vmem:[#allocation8 + $0x78] sm:$0xff]   ;;  %v3244_v58 = vld [vmem:[#allocation8 + $0x40] sm:$0xff]  }
 0x4fa   :  { %v1195_v47 = vadd.f32 2.0, %v1191_v46  ;;  %v1193_v59 = vmul.f32 %v1191_v46, %v1181_v30 }
 0x4fb   :  { %v1194_v4 = vadd.f32 2.0, %v1190_v0  ;;  %v1192_v12 = vmul.f32 %v1190_v0, %v1180_v35  ;;  %v3265_v0 = vld [vmem:[#allocation11 + $0x18] sm:$0xff]  }
 0x4fc   :  { %3371 = vrcp.f32 %v1195_v47 }
 0x4fd   :  { %3373 = vrcp.f32 %v1194_v4 }
 0x503   :  { %v3370_v53 = vpop.eup %3369 }
 0x504   :  { %v733_v54 = vmul.f32 %v3370_v53, %v730_v50  ;;  %v3238_v50 = vld [vmem:[#allocation8 + $0x70] sm:$0xff]   ;;  %v3239_v53 = vld [vmem:[#allocation8 + $0x68] sm:$0xff]  }
 0x506   :  { %v734_v56 = vpack.c.bf16 %v733_v54, %v733_v54  ;;  %v3240_v54 = vld [vmem:[#allocation8 + $0x60] sm:$0xff]  }
 0x508   :  { %2989 = vmatmul.mubr.bf16.vlgmr.msra.gmra.mxu1 %v734_v56  ;;  %v3242_v56 = vld [vmem:[#allocation8 + $0x50] sm:$0xff]  }
 0x509   :  { %v3372_v60 = vpop.eup %3371  ;;  %2902 = vmatpush3.bf16.msra.mxu1 %v3198_v55  ;;  %v3241_v55 = vld [vmem:[#allocation8 + $0x58] sm:$0xff]  }
 0x50a   :  { %2903 = vmatprep.subr.bf16.mxu1 %v3199_v57  ;;  %v1199_v62 = vmul.f32 %v3372_v60, %v1193_v59  ;;  %v3374_v11 = vpop.eup %3373  ;;  %v3243_v57 = vld [vmem:[#allocation8 + $0x48] sm:$0xff]   ;;  %v3245_v59 = vld [vmem:[#allocation12 + $0x78] sm:$0xff]  }
 0x50b   :  { %v1198_v14 = vmul.f32 %v3374_v11, %v1192_v12  ;;  %v3261_v60 = vld [vmem:[#allocation11 + $0x38] sm:$0xff]  }
 0x50c   :  { %v1201_v1 = vpack.c.bf16 %v1199_v62, %v1199_v62  ;;  %v3263_v62 = vld [vmem:[#allocation11 + $0x28] sm:$0xff]  }
 0x50d   :  { %2904 = vmatpush3.bf16.msra.mxu1 %v3200_v61  ;;  %v1200_v15 = vpack.c.bf16 %v1198_v14, %v1198_v14  ;;  %v3262_v61 = vld [vmem:[#allocation11 + $0x30] sm:$0xff]  }
 0x50e   :  { %1334 = vmatprep.mubr.bf16.mxu1 %v1201_v1  ;;  %2905 = vmatprep.subr.bf16.mxu1 %v3201_v63  ;;  %v3264_v63 = vld [vmem:[#allocation11 + $0x20] sm:$0xff]   ;;  %v3266_v1 = vld [vmem:[#allocation11 + $0x10] sm:$0xff]  }
 0x511   :  { %2906 = vmatpush3.bf16.msra.mxu1 %v3202_v2  ;;  %v3267_v2 = vld [vmem:[#allocation11 + $0x8] sm:$0xff]  }
 0x512   :  { %2907 = vmatprep.subr.bf16.mxu1 %v3203_v3 }
 0x515   :  { %2908 = vmatpush3.bf16.msra.mxu1 %v3204_v5 }
 0x516   :  { %2909 = vmatprep.subr.bf16.mxu1 %v3205_v52 }
 0x519   :  { %2910 = vmatpush3.bf16.msra.mxu1 %v3206_v6  ;;  %v2752_v6 = vld [vmem:[#allocation18 + $0x5] ss:$0 sm:$0xff] }
 0x51a   :  { %2911 = vmatprep.subr.bf16.mxu1 %v3207_v7 }
 0x51d   :  { %2912 = vmatpush3.bf16.msra.mxu1 %v3208_v8  ;;  %v2753_v8 = vld [vmem:[#allocation18 + $0x6] ss:$0 sm:$0xff] }
 0x51e   :  { %2913 = vmatprep.subr.bf16.mxu1 %v3209_v9 }
 0x521   :  { %2914 = vmatpush3.bf16.msra.mxu1 %v3210_v51 }
 0x522   :  { %2915 = vmatprep.subr.bf16.mxu1 %v3211_v10 }
 0x525   :  { %2916 = vmatpush3.bf16.msra.mxu1 %v3212_v13 }
 0x526   :  { %2992 = vmatprep.subr.bf16.mxu1 %v3721_v48 }
 0x528   :  { %1335 = vmatmul.mubr.bf16.vlgmr.msra.gmra.mxu1 %v1200_v15 }
 0x529   :  { %3008 = vmatprep.mubr.msk.bf16.mxu1 %vm3722_vm0, %v3721_v48  ;;  %2993 = vmatpush3.bf16.msra.mxu1 %v3237_v49 }
 0x52a   :  { %2994 = vmatprep.subr.bf16.mxu1 %v3721_v48 }
 0x52d   :  { %2995 = vmatpush3.bf16.msra.mxu1 %v3238_v50 }
 0x52e   :  { %2996 = vmatprep.subr.bf16.mxu1 %v3721_v48 }
 0x531   :  { %2997 = vmatpush3.bf16.msra.mxu1 %v3239_v53 }
 0x532   :  { %2998 = vmatprep.subr.bf16.mxu1 %v3721_v48 }
 0x535   :  { %2999 = vmatpush3.bf16.msra.mxu1 %v3240_v54 }
 0x536   :  { %3000 = vmatprep.subr.bf16.mxu1 %v3721_v48 }
 0x539   :  { %3001 = vmatpush3.bf16.msra.mxu1 %v3241_v55 }
 0x53a   :  { %3002 = vmatprep.subr.bf16.mxu1 %v3721_v48 }
 0x53d   :  { %3003 = vmatpush3.bf16.msra.mxu1 %v3242_v56 }
 0x53e   :  { %3004 = vmatprep.subr.bf16.mxu1 %v3721_v48 }
 0x541   :  { %3005 = vmatpush3.bf16.msra.mxu1 %v3243_v57  ;;  %v2795_v57 = vld [vmem:[#allocation18 + $0x8] ss:$0 sm:$0xff] }
 0x542   :  { %3006 = vmatprep.subr.bf16.mxu1 %v3721_v48 }
 0x545   :  { %3007 = vmatpush3.bf16.msra.mxu1 %v3244_v58 }
 0x546   :  { %2932 = vmatprep.subr.bf16.mxu1 %v3245_v59 }
 0x5c8   :  { %v821_v20 = vpop.f32.mrf.mxu1 }
 0x5c9   :  { %v3958_v21 = vadd.f32 %v2689_v19, %v821_v20  ;;  %v3246_v20 = vld [vmem:[#allocation12 + $0x38] sm:$0xff]  }
 0x5ca   :  { %v2990_v22 = vpop.f32.mrf.mxu1 }
 0x5cb   :  { %v1465_v23 = vpack.c.bf16 %v3958_v21, %v3958_v21 }
 0x5cc   :  { %v824_v24 = vpop.f32.mrf.mxu1 }
 0x5cd   :  { %1607 = vmatmul.mubr.bf16.vlgmr.msra.gmra.mxu0 %v1465_v23  ;;  %v3247_v23 = vld [vmem:[#allocation12 + $0x70] sm:$0xff]  }
 0x5ce   :  { %v2991_v25 = vpop.f32.mrf.mxu1  ;;  %3028 = vmatprep.mubr.msk.bf16.mxu0 %vm3722_vm0, %v3721_v48  ;;  %3013 = vmatpush3.bf16.msra.mxu0 %v3261_v60 }
 0x5cf   :  { %3014 = vmatprep.subr.bf16.mxu0 %v3721_v48  ;;  %v3248_v25 = vld [vmem:[#allocation12 + $0x30] sm:$0xff]  }
 0x5d2   :  { %3015 = vmatpush3.bf16.msra.mxu0 %v3262_v61 }
 0x5d3   :  { %3016 = vmatprep.subr.bf16.mxu0 %v3721_v48 }
 0x5d6   :  { %3017 = vmatpush3.bf16.msra.mxu0 %v3263_v62 }
 0x5d7   :  { %3018 = vmatprep.subr.bf16.mxu0 %v3721_v48 }
 0x5da   :  { %3019 = vmatpush3.bf16.msra.mxu0 %v3264_v63 }
 0x5db   :  { %3020 = vmatprep.subr.bf16.mxu0 %v3721_v48 }
 0x5de   :  { %3021 = vmatpush3.bf16.msra.mxu0 %v3265_v0 }
 0x5df   :  { %3022 = vmatprep.subr.bf16.mxu0 %v3721_v48 }
 0x5e2   :  { %3023 = vmatpush3.bf16.msra.mxu0 %v3266_v1 }
 0x5e3   :  { %3024 = vmatprep.subr.bf16.mxu0 %v3721_v48 }
 0x5e6   :  { %3025 = vmatpush3.bf16.msra.mxu0 %v3267_v2 }
 0x5e7   :  { %3026 = vmatprep.subr.bf16.mxu0 %v3721_v48 }
 0x5e8   :  { %v2917_v26 = vpop.f32.mrf.mxu1 }
 0x5ea   :  { %v2918_v27 = vpop.f32.mrf.mxu1 }
 0x5eb   :  { %v2919_v29 = vadd.f32 %v2918_v27, %v2917_v26  ;;  %v3249_v26 = vld [vmem:[#allocation12 + $0x68] sm:$0xff]  }
 0x5ec   :  { %v2920_v30 = vpop.f32.mrf.mxu1  ;;  %v3250_v27 = vld [vmem:[#allocation12 + $0x28] sm:$0xff]  }
 0x5ed   :  { %v1337_v31 = vadd.f32 %v2919_v29, %v2735_v28  ;;  %v3251_v28 = vld [vmem:[#allocation12 + $0x60] sm:$0xff]   ;;  %v3253_v30 = vld [vmem:[#allocation12 + $0x58] sm:$0xff]  }
 0x5ee   :  { %v2921_v32 = vpop.f32.mrf.mxu1  ;;  %v3252_v29 = vld [vmem:[#allocation12 + $0x20] sm:$0xff]  }
 0x5ef   :  { %1342 = vadd.xlane.f32.xlu0 %v1337_v31  ;;  %v3255_v32 = vld [vmem:[#allocation12 + $0x50] sm:$0xff]  }
 0x678   :  { %v1343_v33 = vpop.xlane.xlu0 %1342 }
 0x679   :  { %v1344_v34 = vmul.f32 0.0078125, %v1343_v33  ;;  %v3256_v33 = vld [vmem:[#allocation12 + $0x10] sm:$0xff]  }
 0x67b   :  { %v3964_v35 = vsub.f32 %v1337_v31, %v1344_v34  ;;  %v3254_v31 = vld [vmem:[#allocation12 + $0x18] sm:$0xff]   ;;  %v3257_v34 = vld [vmem:[#allocation12 + $0x48] sm:$0xff]  }
 0x67d   :  { %v1346_v36 = vmul.f32 %v3964_v35, %v3964_v35 }
 0x67f   :  { %1347 = vadd.xlane.f32.xlu1 %v1346_v36  ;;  %v3259_v36 = vld [vmem:[#allocation12 + $0x40] sm:$0xff]  }
 0x68d   :  { %v1608_v43 = vpop.f32.mrf.mxu0 }
 0x68e   :  { %v3973_v44 = vadd.f32 %v1608_v43, %v1487_v40  ;;  %v2754_v43 = vld [vmem:[#allocation18 + $0x7] ss:$0 sm:$0xff] }
 0x68f   :  { %v1610_v45 = vpop.f32.mrf.mxu0 }
 0x690   :  { %1615 = vst [vmem:[#allocation21] sm:$0xff] %v3973_v44  ;;  %v3976_v42 = vadd.f32 %v1610_v45, %v1491_v41  ;;  %v1617_v40 = vpack.c.bf16 %v3973_v44, %v3973_v44  ;;  %v3268_v41 = vld [vmem:[#allocation11] sm:$0xff]  }
 0x691   :  { %v1612_v46 = vpop.f32.mrf.mxu0  ;;  %3027 = vmatpush3.bf16.msra.mxu0 %v3268_v41  ;;  %v3277_v41 = vld [vmem:[#allocation15 + $0x70] ss:$8 sps:$4 sm:$0xff]  }
 0x692   :  { %1616 = vst [vmem:[#allocation21 + $0x8] sm:$0xff] %v3976_v42  ;;  %v1618_v24 = vpack.c.bf16 %v3976_v42, %v3976_v42 }
 0x693   :  { %v1613_v47 = vpop.f32.mrf.mxu0 }
 0x708   :  { %v1348_v3 = vpop.xlane.xlu1 %1347 }
 0x709   :  { %v1349_v4 = vmul.f32 0.0078125, %v1348_v3  ;;  %v3269_v3 = vld [vmem:[#allocation14 + $0x38] sm:$0xff]  }
 0x70b   :  { %v1350_v5 = vadd.f32 1e-05, %v1349_v4  ;;  %v3270_v4 = vld [vmem:[#allocation14 + $0x30] sm:$0xff]  }
 0x70d   :  { %3375 = vrsqrt.f32 %v1350_v5  ;;  %v3271_v5 = vld [vmem:[#allocation14 + $0x28] sm:$0xff]  }
 0x71a   :  { %v3376_v52 = vpop.eup %3375 }
 0x71b   :  { %v1352_v7 = vmul.f32 %v3376_v52, %v3964_v35  ;;  %v3258_v35 = vld [vmem:[#allocation12 + $0x8] sm:$0xff]   ;;  %v3272_v52 = vld [vmem:[#allocation14 + $0x20] sm:$0xff]  }
 0x71d   :  { %v1357_v9 = vmul.f32 %v2752_v6, %v1352_v7  ;;  %v3273_v6 = vld [vmem:[#allocation14 + $0x18] sm:$0xff]   ;;  %v3274_v7 = vld [vmem:[#allocation14 + $0x10] sm:$0xff]  }
 0x71f   :  { %v1362_v51 = vadd.f32 %v2753_v8, %v1357_v9  ;;  %v3275_v8 = vld [vmem:[#allocation14 + $0x8] sm:$0xff]   ;;  %v3276_v9 = vld [vmem:[#allocation14] sm:$0xff]  }
 0x721   :  { %v1363_v10 = vmin.f32 %v1362_v51, 20.0 }
 0x723   :  { %v1364_v11 = vmul.f32 1.442695, %v1363_v10 }
 0x725   :  { %3377 = vpow2.f32 %v1364_v11 }
 0x732   :  { %v3378_v12 = vpop.eup %3377 }
 0x733   :  { %v1366_v13 = vadd.f32 2.0, %v3378_v12 }
 0x735   :  { %v1367_v14 = vmul.f32 %v3378_v12, %v1366_v13  ;;  %v4015_v13 = vld [vmem:[#allocation18 + $0x9] ss:$0 sm:$0xff] }
 0x737   :  { %v1369_v15 = vadd.f32 2.0, %v1367_v14  ;;  %v1368_v16 = vmul.f32 %v1367_v14, %v1362_v51 }
 0x739   :  { %3379 = vrcp.f32 %v1369_v15  ;;  %v4017_v15 = vld [vmem:[#allocation18 + $0xa] ss:$0 sm:$0xff] }
 0x746   :  { %v3380_v17 = vpop.eup %3379 }
 0x747   :  { %v1371_v19 = vmul.f32 %v3380_v17, %v1368_v16 }
 0x749   :  { %v1372_v22 = vpack.c.bf16 %v1371_v19, %v1371_v19 }
 0x74b   :  { %3009 = vmatmul.mubr.bf16.vlgmr.msra.gmra.mxu1 %v1372_v22 }
 0x74c   :  { %2933 = vmatpush3.bf16.msra.mxu1 %v3246_v20  ;;  %1779 = vmatprep.mubr.bf16.mxu1 %v1618_v24 }
 0x74d   :  { %2934 = vmatprep.subr.bf16.mxu1 %v3247_v23 }
 0x750   :  { %2935 = vmatpush3.bf16.msra.mxu1 %v3248_v25 }
 0x751   :  { %2936 = vmatprep.subr.bf16.mxu1 %v3249_v26 }
 0x754   :  { %2937 = vmatpush3.bf16.msra.mxu1 %v3250_v27 }
 0x755   :  { %2938 = vmatprep.subr.bf16.mxu1 %v3251_v28 }
 0x758   :  { %2939 = vmatpush3.bf16.msra.mxu1 %v3252_v29  ;;  %v2807_v29 = vld [vmem:[#allocation18 + $0xc] ss:$0 sm:$0xff] }
 0x759   :  { %2940 = vmatprep.subr.bf16.mxu1 %v3253_v30 }
 0x75c   :  { %2941 = vmatpush3.bf16.msra.mxu1 %v3254_v31 }
 0x75d   :  { %2942 = vmatprep.subr.bf16.mxu1 %v3255_v32 }
 0x760   :  { %2943 = vmatpush3.bf16.msra.mxu1 %v3256_v33 }
 0x761   :  { %2944 = vmatprep.subr.bf16.mxu1 %v3257_v34 }
 0x764   :  { %2945 = vmatpush3.bf16.msra.mxu1 %v3258_v35 }
 0x765   :  { %2946 = vmatprep.subr.bf16.mxu1 %v3259_v36 }
 0x768   :  { %2947 = vmatpush3.bf16.msra.mxu1 %v3260_v39 }
 0x769   :  { %3032 = vmatprep.subr.bf16.mxu1 %v3721_v48 }
 0x76b   :  { %1780 = vmatmul.mubr.bf16.vlgmr.msra.gmra.mxu1 %v1617_v40 }
 0x76c   :  { %3048 = vmatprep.mubr.msk.bf16.mxu1 %vm3722_vm0, %v3721_v48  ;;  %3033 = vmatpush3.bf16.msra.mxu1 %v3269_v3 }
 0x76d   :  { %3034 = vmatprep.subr.bf16.mxu1 %v3721_v48 }
 0x770   :  { %3035 = vmatpush3.bf16.msra.mxu1 %v3270_v4 }
 0x771   :  { %3036 = vmatprep.subr.bf16.mxu1 %v3721_v48 }
 0x774   :  { %3037 = vmatpush3.bf16.msra.mxu1 %v3271_v5 }
 0x775   :  { %3038 = vmatprep.subr.bf16.mxu1 %v3721_v48 }
 0x778   :  { %3039 = vmatpush3.bf16.msra.mxu1 %v3272_v52 }
 0x779   :  { %3040 = vmatprep.subr.bf16.mxu1 %v3721_v48 }
 0x77c   :  { %3041 = vmatpush3.bf16.msra.mxu1 %v3273_v6 }
 0x77d   :  { %3042 = vmatprep.subr.bf16.mxu1 %v3721_v48 }
 0x780   :  { %3043 = vmatpush3.bf16.msra.mxu1 %v3274_v7 }
 0x781   :  { %3044 = vmatprep.subr.bf16.mxu1 %v3721_v48 }
 0x784   :  { %3045 = vmatpush3.bf16.msra.mxu1 %v3275_v8 }
 0x785   :  { %3046 = vmatprep.subr.bf16.mxu1 %v3721_v48 }
 0x788   :  { %3047 = vmatpush3.bf16.msra.mxu1 %v3276_v9 }
 0x80b   :  { %v1459_v45 = vpop.f32.mrf.mxu1 }
 0x80c   :  { %v1460_v42 = vadd.f32 %v2754_v43, %v1459_v45  ;;  %v3279_v43 = vld [vmem:[#allocation15 + $0x74] ss:$8 sps:$4 sm:$0xff]   ;;  %v3282_v45 = vld [vmem:[#allocation15 + $0x64] ss:$8 sps:$4 sm:$0xff]  }
 0x80d   :  { %v3010_v46 = vpop.f32.mrf.mxu1  ;;  %2218 = vmatprep.subr.bf16.mxu0 %v3279_v43  ;;  %v3306_v43 = vld [vmem:[#allocation17 + $0x64] ss:$8 sps:$4 sm:$0xff]  }
 0x80e   :  { %v1791_v47 = vpack.c.bf16 %v1460_v42, %v3958_v21  ;;  %v3280_v42 = vld [vmem:[#allocation15 + $0x60] ss:$8 sps:$4 sm:$0xff]   ;;  %v3285_v46 = vld [vmem:[#allocation15 + $0x54] ss:$8 sps:$4 sm:$0xff]  }
 0x80f   :  { %v1462_v49 = vpop.f32.mrf.mxu1 }
 0x810   :  { %3029 = vmatmul.mubr.bf16.vlgmr.msra.gmra.mxu0 %v1791_v47  ;;  %v3283_v47 = vld [vmem:[#allocation15 + $0x50] ss:$8 sps:$4 sm:$0xff]   ;;  %v3288_v49 = vld [vmem:[#allocation15 + $0x44] ss:$8 sps:$4 sm:$0xff]  }
 0x811   :  { %v3011_v50 = vpop.f32.mrf.mxu1  ;;  %2250 = vmatprep.mubr.bf16.mxu0 %v3723_v18  ;;  %2219 = vmatpush1.bf16.msra.mxu0 %v3277_v41  ;;  %v3301_v41 = vld [vmem:[#allocation17 + $0x70] ss:$8 sps:$4 sm:$0xff]  }
 0x812   :  { %2220 = vmatprep.subr.bf16.mxu0 %v3282_v45  ;;  %v3286_v50 = vld [vmem:[#allocation15 + $0x40] ss:$8 sps:$4 sm:$0xff]  }
 0x813   :  { %v3304_v45 = vld [vmem:[#allocation17 + $0x60] ss:$8 sps:$4 sm:$0xff]  }
 0x815   :  { %2221 = vmatpush1.bf16.msra.mxu0 %v3280_v42  ;;  %v3309_v42 = vld [vmem:[#allocation17 + $0x54] ss:$8 sps:$4 sm:$0xff]  }
 0x816   :  { %2222 = vmatprep.subr.bf16.mxu0 %v3285_v46  ;;  %v3307_v46 = vld [vmem:[#allocation17 + $0x50] ss:$8 sps:$4 sm:$0xff]  }
 0x819   :  { %2223 = vmatpush1.bf16.msra.mxu0 %v3283_v47  ;;  %v3312_v47 = vld [vmem:[#allocation17 + $0x44] ss:$8 sps:$4 sm:$0xff]  }
 0x81a   :  { %2224 = vmatprep.subr.bf16.mxu0 %v3288_v49  ;;  %v3310_v49 = vld [vmem:[#allocation17 + $0x40] ss:$8 sps:$4 sm:$0xff]  }
 0x81d   :  { %2225 = vmatpush1.bf16.msra.mxu0 %v3286_v50  ;;  %v3313_v50 = vld [vmem:[#allocation17 + $0x30] ss:$8 sps:$4 sm:$0xff]  }
 0x82b   :  { %v2948_v44 = vpop.f32.mrf.mxu1 }
 0x82d   :  { %v2949_v53 = vpop.f32.mrf.mxu1 }
 0x82e   :  { %v4003_v54 = vadd.f32 %v2949_v53, %v2948_v44  ;;  %v3291_v44 = vld [vmem:[#allocation15 + $0x34] ss:$8 sps:$4 sm:$0xff]   ;;  %v3289_v53 = vld [vmem:[#allocation15 + $0x30] ss:$8 sps:$4 sm:$0xff]  }
 0x82f   :  { %v2951_v55 = vpop.f32.mrf.mxu1  ;;  %2226 = vmatprep.subr.bf16.mxu0 %v3291_v44  ;;  %v3315_v44 = vld [vmem:[#allocation17 + $0x34] ss:$8 sps:$4 sm:$0xff]  }
 0x830   :  { %v3294_v55 = vld [vmem:[#allocation15 + $0x24] ss:$8 sps:$4 sm:$0xff]   ;;  %2227 = vmatpush1.bf16.msra.mxu0 %v3289_v53 }
 0x831   :  { %v2952_v56 = vpop.f32.mrf.mxu1  ;;  %2228 = vmatprep.subr.bf16.mxu0 %v3294_v55  ;;  %v3318_v53 = vld [vmem:[#allocation17 + $0x24] ss:$8 sps:$4 sm:$0xff]   ;;  %v3316_v55 = vld [vmem:[#allocation17 + $0x20] ss:$8 sps:$4 sm:$0xff]  }
 0x832   :  { %v3292_v56 = vld [vmem:[#allocation15 + $0x20] ss:$8 sps:$4 sm:$0xff]  }
 0x834   :  { %2229 = vmatpush1.bf16.msra.mxu0 %v3292_v56  ;;  %v3321_v56 = vld [vmem:[#allocation17 + $0x14] ss:$8 sps:$4 sm:$0xff]  }
 0x8d0   :  { %v1895_v58 = vpop.f32.mrf.mxu0 }
 0x8d1   :  { %v1896_v59 = vadd.f32 %v2795_v57, %v1895_v58  ;;  %v3295_v58 = vld [vmem:[#allocation15 + $0x10] ss:$8 sps:$4 sm:$0xff]  }
 0x8d2   :  { %v3030_v60 = vpop.f32.mrf.mxu0 }
 0x8d3   :  { %v1902_v61 = vadd.f32 %v4003_v54, %v1896_v59  ;;  %v3300_v59 = vld [vmem:[#allocation15 + $0x4] ss:$8 sps:$4 sm:$0xff]   ;;  %v3298_v60 = vld [vmem:[#allocation15] ss:$8 sps:$4 sm:$0xff]  }
 0x8d4   :  { %v1898_v62 = vpop.f32.mrf.mxu0 }
 0x8d5   :  { %v4006_v63 = vadd.f32 %v2795_v57, %v1898_v62  ;;  %1912 = vadd.xlane.f32.xlu0 %v1902_v61  ;;  %v3297_v57 = vld [vmem:[#allocation15 + $0x14] ss:$8 sps:$4 sm:$0xff]  }
 0x8d6   :  { %v3031_v21 = vpop.f32.mrf.mxu0  ;;  %2230 = vmatprep.subr.bf16.mxu0 %v3297_v57  ;;  %v3319_v57 = vld [vmem:[#allocation17 + $0x10] ss:$8 sps:$4 sm:$0xff]  }
 0x8d7   :  { %2231 = vmatpush1.bf16.msra.mxu0 %v3295_v58  ;;  %v3324_v58 = vld [vmem:[#allocation17 + $0x4] ss:$8 sps:$4 sm:$0xff]  }
 0x8d8   :  { %2232 = vmatprep.subr.bf16.mxu0 %v3300_v59  ;;  %v3322_v59 = vld [vmem:[#allocation17] ss:$8 sps:$4 sm:$0xff]  }
 0x8db   :  { %2233 = vmatpush1.bf16.msra.mxu0 %v3298_v60  ;;  %v3327_v60 = vld [vmem:[#allocation17 + $0xf4] ss:$8 sps:$4 sm:$0xff]  }
 0x95e   :  { %v1913_v0 = vpop.xlane.xlu0 %1912 }
 0x95f   :  { %v1914_v1 = vmul.f32 0.0078125, %v1913_v0 }
 0x961   :  { %v1915_v18 = vsub.f32 %v1902_v61, %v1914_v1  ;;  %v2816_v1 = vld [vmem:[#allocation18 + $0xd] ss:$0 sm:$0xff] }
 0x963   :  { %v1916_v2 = vmul.f32 %v1915_v18, %v1915_v18 }
 0x965   :  { %1917 = vadd.xlane.f32.xlu1 %v1916_v2  ;;  %v2817_v2 = vld [vmem:[#allocation18 + $0xe] ss:$0 sm:$0xff] }
 0x9ee   :  { %v1918_v51 = vpop.xlane.xlu1 %1917 }
 0x9ef   :  { %v1919_v10 = vmul.f32 0.0078125, %v1918_v51 }
 0x9f1   :  { %v1920_v11 = vadd.f32 1e-05, %v1919_v10 }
 0x9f3   :  { %3381 = vrsqrt.f32 %v1920_v11 }
 0xa00   :  { %v3382_v12 = vpop.eup %3381 }
 0xa01   :  { %v1922_v14 = vmul.f32 %v3382_v12, %v1915_v18 }
 0xa03   :  { %v1927_v16 = vmul.f32 %v4015_v13, %v1922_v14  ;;  %v2818_v14 = vld [vmem:[%s4084_s12 + $0x6] ss:$8 sm:$0x3] }
 0xa05   :  { %v1932_v17 = vadd.f32 %v4017_v15, %v1927_v16  ;;  %v2131_v16 = vrot.slane %v2818_v14, %v3881_v37 }
 0xa07   :  { %v1933_v19 = vmin.f32 %v1932_v17, 20.0 }
 0xa09   :  { %v1934_v20 = vmul.f32 1.442695, %v1933_v19 }
 0xa0b   :  { %3383 = vpow2.f32 %v1934_v20 }
 0xa18   :  { %v3384_v22 = vpop.eup %3383 }
 0xa19   :  { %v1936_v48 = vadd.f32 2.0, %v3384_v22 }
 0xa1b   :  { %v1937_v23 = vmul.f32 %v3384_v22, %v1936_v48 }
 0xa1d   :  { %v1939_v24 = vadd.f32 2.0, %v1937_v23  ;;  %v1938_v25 = vmul.f32 %v1937_v23, %v1932_v17  ;;  %v2135_v17 = vrot.slane %v2818_v14, %v3883_v38  ;;  %v2804_v23 = vld [vmem:[#allocation18 + $0xb] ss:$0 sm:$0xff] }
 0xa1f   :  { %3385 = vrcp.f32 %v1939_v24 }
 0xa2c   :  { %v3386_v26 = vpop.eup %3385 }
 0xa2d   :  { %v1941_v27 = vmul.f32 %v3386_v26, %v1938_v25 }
 0xa2f   :  { %v1966_v28 = vpack.c.bf16 %v1941_v27, %v1941_v27  ;;  %1964 = vst [vmem:[#allocation23] sm:$0xff] %v1941_v27  ;;  %v1908_v27 = vsub.f32 %v2804_v23, %v4003_v54 }
 0xa31   :  { %3049 = vmatmul.mubr.bf16.vlgmr.msra.gmra.mxu1 %v1966_v28  ;;  %v1909_v28 = vadd.f32 %v1908_v27, %v4006_v63 }
 0xaf1   :  { %v2070_v30 = vpop.f32.mrf.mxu1 }
 0xaf2   :  { %v2071_v31 = vadd.f32 %v2807_v29, %v2070_v30 }
 0xaf3   :  { %v3050_v32 = vpop.f32.mrf.mxu1 }
 0xaf4   :  { %2078 = vadd.xlane.f32.xlu0 %v2071_v31 }
 0xaf5   :  { %v2073_v33 = vpop.f32.mrf.mxu1 }
 0xaf7   :  { %v3051_v34 = vpop.f32.mrf.mxu1 }
 0xb7d   :  { %v2079_v35 = vpop.xlane.xlu0 %2078 }
 0xb7e   :  { %v2080_v36 = vmul.f32 0.0078125, %v2079_v35 }
 0xb80   :  { %v2081_v39 = vsub.f32 %v2071_v31, %v2080_v36 }
 0xb82   :  { %v2082_v40 = vmul.f32 %v2081_v39, %v2081_v39 }
 0xb84   :  { %2083 = vadd.xlane.f32.xlu1 %v2082_v40  ;;  %v3303_v40 = vld [vmem:[#allocation17 + $0x74] ss:$8 sps:$4 sm:$0xff]  }
 0xb85   :  { %2530 = vmatprep.subr.bf16.mxu1 %v3303_v40 }
 0xb86   :  { %2531 = vmatpush1.bf16.msra.mxu1 %v3301_v41 }
 0xb87   :  { %2532 = vmatprep.subr.bf16.mxu1 %v3306_v43 }
 0xb8a   :  { %2533 = vmatpush1.bf16.msra.mxu1 %v3304_v45 }
 0xb8b   :  { %2534 = vmatprep.subr.bf16.mxu1 %v3309_v42 }
 0xb8e   :  { %2535 = vmatpush1.bf16.msra.mxu1 %v3307_v46 }
 0xb8f   :  { %2536 = vmatprep.subr.bf16.mxu1 %v3312_v47 }
 0xb92   :  { %2537 = vmatpush1.bf16.msra.mxu1 %v3310_v49 }
 0xb93   :  { %2538 = vmatprep.subr.bf16.mxu1 %v3315_v44 }
 0xb96   :  { %2539 = vmatpush1.bf16.msra.mxu1 %v3313_v50 }
 0xb97   :  { %2540 = vmatprep.subr.bf16.mxu1 %v3318_v53 }
 0xb9a   :  { %2541 = vmatpush1.bf16.msra.mxu1 %v3316_v55 }
 0xb9b   :  { %2542 = vmatprep.subr.bf16.mxu1 %v3321_v56 }
 0xb9e   :  { %2543 = vmatpush1.bf16.msra.mxu1 %v3319_v57 }
 0xb9f   :  { %2544 = vmatprep.subr.bf16.mxu1 %v3324_v58 }
 0xba2   :  { %2545 = vmatpush1.bf16.msra.mxu1 %v3322_v59 }
 0xba3   :  { %2546 = vmatprep.subr.bf16.mxu1 %v3327_v60 }
 0xc0d   :  { %v2084_v61 = vpop.xlane.xlu1 %2083 }
 0xc0e   :  { %v2085_v62 = vmul.f32 0.0078125, %v2084_v61  ;;  %v3325_v61 = vld [vmem:[#allocation17 + $0xf0] ss:$8 sps:$4 sm:$0xff]  }
 0xc0f   :  { %2547 = vmatpush2.bf16.msra.mxu1 %v3325_v61 }
 0xc10   :  { %v2086_v21 = vadd.f32 1e-05, %v2085_v62  ;;  %v3330_v62 = vld [vmem:[#allocation17 + $0xe4] ss:$8 sps:$4 sm:$0xff]  }
 0xc11   :  { %2548 = vmatprep.subr.bf16.mxu1 %v3330_v62 }
 0xc12   :  { %3387 = vrsqrt.f32 %v2086_v21  ;;  %v3328_v21 = vld [vmem:[#allocation17 + $0xe0] ss:$8 sps:$4 sm:$0xff]  }
 0xc13   :  { %2549 = vmatpush2.bf16.msra.mxu1 %v3328_v21 }
 0xc1f   :  { %v3388_v0 = vpop.eup %3387 }
 0xc20   :  { %v2088_v18 = vmul.f32 %v3388_v0, %v2081_v39  ;;  %v3333_v0 = vld [vmem:[#allocation17 + $0xd4] ss:$8 sps:$4 sm:$0xff]  }
 0xc21   :  { %2550 = vmatprep.subr.bf16.mxu1 %v3333_v0 }
 0xc22   :  { %v2093_v3 = vmul.f32 %v2816_v1, %v2088_v18  ;;  %v3331_v1 = vld [vmem:[#allocation17 + $0xd0] ss:$8 sps:$4 sm:$0xff]   ;;  %v3336_v18 = vld [vmem:[#allocation17 + $0xc4] ss:$8 sps:$4 sm:$0xff]  }
 0xc23   :  { %2551 = vmatpush2.bf16.msra.mxu1 %v3331_v1 }
 0xc24   :  { %v2098_v4 = vadd.f32 %v2817_v2, %v2093_v3  ;;  %v3334_v2 = vld [vmem:[#allocation17 + $0xc0] ss:$8 sps:$4 sm:$0xff]   ;;  %2552 = vmatprep.subr.bf16.mxu1 %v3336_v18  ;;  %v3339_v3 = vld [vmem:[#allocation17 + $0xb4] ss:$8 sps:$4 sm:$0xff]  }
 0xc26   :  { %v2099_v5 = vmin.f32 %v2098_v4, 20.0 }
 0xc27   :  { %2553 = vmatpush2.bf16.msra.mxu1 %v3334_v2 }
 0xc28   :  { %v2100_v52 = vmul.f32 1.442695, %v2099_v5  ;;  %2554 = vmatprep.subr.bf16.mxu1 %v3339_v3  ;;  %v3342_v5 = vld [vmem:[#allocation17 + $0xa4] ss:$8 sps:$4 sm:$0xff]  }
 0xc2a   :  { %3389 = vpow2.f32 %v2100_v52  ;;  %v3340_v52 = vld [vmem:[#allocation17 + $0xa0] ss:$8 sps:$4 sm:$0xff]  }
 0xc37   :  { %v3390_v6 = vpop.eup %3389 }
 0xc38   :  { %v2102_v7 = vadd.f32 2.0, %v3390_v6 }
 0xc3a   :  { %v2103_v8 = vmul.f32 %v3390_v6, %v2102_v7  ;;  %v3345_v6 = vld [vmem:[#allocation17 + $0x94] ss:$8 sps:$4 sm:$0xff]   ;;  %v3343_v7 = vld [vmem:[#allocation17 + $0x90] ss:$8 sps:$4 sm:$0xff]  }
 0xc3c   :  { %v2105_v9 = vadd.f32 2.0, %v2103_v8  ;;  %v2104_v51 = vmul.f32 %v2103_v8, %v2098_v4  ;;  %v3337_v4 = vld [vmem:[#allocation17 + $0xb0] ss:$8 sps:$4 sm:$0xff]   ;;  %v3348_v8 = vld [vmem:[#allocation17 + $0x84] ss:$8 sps:$4 sm:$0xff]  }
 0xc3d   :  { %2555 = vmatpush2.bf16.msra.mxu1 %v3337_v4 }
 0xc3e   :  { %3391 = vrcp.f32 %v2105_v9  ;;  %2556 = vmatprep.subr.bf16.mxu1 %v3342_v5  ;;  %v3346_v9 = vld [vmem:[#allocation17 + $0x80] ss:$8 sps:$4 sm:$0xff]  }
 0xc41   :  { %2557 = vmatpush2.bf16.msra.mxu1 %v3340_v52 }
 0xc42   :  { %2558 = vmatprep.subr.bf16.mxu1 %v3345_v6 }
 0xc45   :  { %2559 = vmatpush2.bf16.msra.mxu1 %v3343_v7 }
 0xc46   :  { %2560 = vmatprep.subr.bf16.mxu1 %v3348_v8 }
 0xc49   :  { %2561 = vmatpush2.bf16.msra.mxu1 %v3346_v9 }
 0xc4b   :  { %v3392_v10 = vpop.eup %3391 }
 0xc4c   :  { %v2107_v11 = vmul.f32 %v3392_v10, %v2104_v51 }
 0xc4e   :  { %v2108_v12 = vpack.c.bf16 %v2107_v11, %v2107_v11 }
 0xc50   :  { %2251 = vmatmul.mubr.bf16.vlgmr.msra.gmra.mxu0 %v2108_v12 }
 0xd10   :  { %v2252_v19 = vpop.f32.mrf.mxu0 }
 0xd11   :  { %v2253_v22 = vadd.f32 %v2252_v19, %v2131_v16  ;;  %v2836_v19 = vld [vmem:[%s4084_s12 + $0x10] ss:$8 sm:$0x3] }
 0xd12   :  { %v2254_v20 = vpop.f32.mrf.mxu0 }
 0xd13   :  { %v2255_v48 = vadd.f32 %v2254_v20, %v2135_v17  ;;  %v2835_v17 = vld [vmem:[%s4084_s12 + $0x7] ss:$8 sm:$0x3]  ;;  %s3724_s12 = smov [#allocation21]  }
 0xd14   :  { %v2256_v24 = vpop.f32.mrf.mxu0  ;;  %v2283_v20 = vrot.slane %v2835_v17, %v3881_v37  ;;  %s2589_s11 = sshll.u32 %s3724_s12, 4  ;;  %s2590_s11 = int_to_ptr.vmem [resolvable:$true] %s2589_s11 }
 0xd15   :  { %v2263_v25 = vadd.f32 %v2255_v48, %v2253_v22  ;;  %s3609_s28 = scalar_lea.vmem %s2590_s11, 256  ;;  %p3614_p9 = scmp.lt.s32.totalorder %s2590_s11, %s2590_s11 }
 0xd16   :  { %v2257_v26 = vpop.f32.mrf.mxu0  ;;  %p3610_p8 = scmp.ne.s32.totalorder %s2590_s11, %s3609_s28  ;;  %p3615_p10 = scmp.lt.s32.totalorder %s3609_s28, %s3609_s28 }
 0xd17   :  { %2264 = vadd.xlane.f32.xlu0 %v2263_v25  ;;  %v2296_v25 = vrot.slane %v2836_v19, %v3881_v37  ;;  %v2300_v26 = vrot.slane %v2836_v19, %v3883_v38 }
 0xd18   :  { %p3616_p11 = por %p3615_p10, %p3614_p9 }
 0xd1a   :  { %p3617_p12 = pnand %p3616_p11, %p3610_p8 }
 0xd1b   :  { %1942 = vadd.xlane.f32.xlu0 %v1909_v28 }
 0xda0   :  { %v2265_v29 = vpop.xlane.xlu0 %2264 }
 0xda1   :  { %v2266_v30 = vmul.f32 0.00390625, %v2265_v29 }
 0xda3   :  { %v4028_v31 = vsub.f32 %v2253_v22, %v2266_v30  ;;  %v4030_v32 = vsub.f32 %v2255_v48, %v2266_v30  ;;  %v2287_v22 = vrot.slane %v2835_v17, %v3883_v38 }
 0xda4   :  { %v1943_v33 = vpop.xlane.xlu0 %1942 }
 0xda5   :  { %v1944_v34 = vmul.f32 0.0078125, %v1943_v33  ;;  %v2269_v35 = vmul.f32 %v4028_v31, %v4028_v31  ;;  %v2270_v36 = vmul.f32 %v4030_v32, %v4030_v32 }
 0xda7   :  { %v4036_v39 = vsub.f32 %v1909_v28, %v1944_v34  ;;  %v2271_v54 = vadd.f32 %v2270_v36, %v2269_v35 }
 0xda9   :  { %2272 = vadd.xlane.f32.xlu1 %v2271_v54  ;;  %v1946_v63 = vmul.f32 %v4036_v39, %v4036_v39 }
 0xdad   :  { %1947 = vadd.xlane.f32.xlu1 %v1946_v63 }
 0xe32   :  { %v2273_v51 = vpop.xlane.xlu1 %2272 }
 0xe33   :  { %v2274_v10 = vmul.f32 0.00390625, %v2273_v51 }
 0xe35   :  { %v2275_v11 = vadd.f32 1e-05, %v2274_v10 }
 0xe36   :  { %v1948_v12 = vpop.xlane.xlu1 %1947 }
 0xe37   :  { %3393 = vrsqrt.f32 %v2275_v11  ;;  %v1949_v14 = vmul.f32 0.0078125, %v1948_v12 }
 0xe39   :  { %v1950_v16 = vadd.f32 1e-05, %v1949_v14 }
 0xe3b   :  { %3395 = vrsqrt.f32 %v1950_v16 }
 0xe44   :  { %v3394_v48 = vpop.eup %3393 }
 0xe45   :  { %v2277_v23 = vmul.f32 %v3394_v48, %v4028_v31  ;;  %v2278_v24 = vmul.f32 %v3394_v48, %v4030_v32 }
 0xe47   :  { %v2291_v27 = vmul.f32 %v2287_v22, %v2278_v24  ;;  %v2290_v28 = vmul.f32 %v2283_v20, %v2277_v23 }
 0xe48   :  { %v3396_v29 = vpop.eup %3395 }
 0xe49   :  { %v2304_v30 = vadd.f32 %v2300_v26, %v2291_v27  ;;  %v2303_v33 = vadd.f32 %v2296_v25, %v2290_v28  ;;  %v1952_v34 = vmul.f32 %v3396_v29, %v4036_v39 }
 0xe4b   :  { %v2306_v35 = vmin.f32 %v2304_v30, 20.0  ;;  %v2305_v36 = vmin.f32 %v2303_v33, 20.0  ;;  %v1953_v54 = vmul.f32 %v4015_v13, %v1952_v34 }
 0xe4d   :  { %v2309_v63 = vmul.f32 1.442695, %v2306_v35  ;;  %v2307_v40 = vmul.f32 1.442695, %v2305_v36  ;;  %v1954_v31 = vadd.f32 %v4017_v15, %v1953_v54 }
 0xe4f   :  { %3397 = vpow2.f32 %v2309_v63  ;;  %v1955_v32 = vmin.f32 %v1954_v31, 20.0 }
 0xe50   :  { %3399 = vpow2.f32 %v2307_v40 }
 0xe51   :  { %v1956_v41 = vmul.f32 1.442695, %v1955_v32 }
 0xe53   :  { %3401 = vpow2.f32 %v1956_v41 }
 0xe5c   :  { %v3398_v43 = vpop.eup %3397 }
 0xe5d   :  { %v3400_v45 = vpop.eup %3399  ;;  %v2312_v42 = vadd.f32 2.0, %v3398_v43 }
 0xe5e   :  { %v2311_v46 = vadd.f32 2.0, %v3400_v45 }
 0xe5f   :  { %v2314_v47 = vmul.f32 %v3398_v43, %v2312_v42 }
 0xe60   :  { %v3402_v49 = vpop.eup %3401  ;;  %v2313_v39 = vmul.f32 %v3400_v45, %v2311_v46 }
 0xe61   :  { %v2318_v50 = vadd.f32 2.0, %v2314_v47  ;;  %v1958_v44 = vadd.f32 2.0, %v3402_v49  ;;  %v2316_v15 = vmul.f32 %v2314_v47, %v2304_v30 }
 0xe62   :  { %v2317_v53 = vadd.f32 2.0, %v2313_v39  ;;  %v2315_v57 = vmul.f32 %v2313_v39, %v2303_v33 }
 0xe63   :  { %3403 = vrcp.f32 %v2318_v50  ;;  %v1959_v13 = vmul.f32 %v3402_v49, %v1958_v44 }
 0xe64   :  { %3405 = vrcp.f32 %v2317_v53 }
 0xe65   :  { %v1961_v55 = vadd.f32 2.0, %v1959_v13  ;;  %v1960_v62 = vmul.f32 %v1959_v13, %v1954_v31 }
 0xe67   :  { %3407 = vrcp.f32 %v1961_v55 }
 0xe70   :  { %v3404_v56 = vpop.eup %3403 }
 0xe71   :  { %v3406_v58 = vpop.eup %3405  ;;  %v2322_v59 = vmul.f32 %v3404_v56, %v2316_v15 }
 0xe72   :  { %v2321_v60 = vmul.f32 %v3406_v58, %v2315_v57 }
 0xe73   :  { %v2324_v61 = vpack.c.bf16 %v2322_v59, %v2322_v59 }
 0xe74   :  { %v3408_v21 = vpop.eup %3407  ;;  %v2323_v0 = vpack.c.bf16 %v2321_v60, %v2321_v60 }
 0xe75   :  { %2562 = vmatprep.mubr.bf16.mxu1 %v2324_v61  ;;  %v1963_v1 = vmul.f32 %v3408_v21, %v1960_v62 }
 0xe76   :  { %2563 = vmatmul.mubr.bf16.vlgmr.msra.gmra.mxu1 %v2323_v0 }
 0xe77   :  { %1965 = vst [vmem:[#allocation24] sm:$0xff] %v1963_v1 }
 0xe78   :  { %3620 = shalt.err (!%p3617_p12)
}
 0xe79   :  { %2592 = dma.vmem_to_hbm [thread:$0]  %s2590_s11, 256, %s4087_s15, [#allocation22]  }
 0xe7a   :  { %s3725_s29 = smov [#allocation23]   ;;  %s3726_s2 = smov [#allocation24]  }
 0xe7b   :  { %s2599_s0 = sshll.u32 %s3725_s29, 4  ;;  %s2609_s30 = sshll.u32 %s3726_s2, 4  ;;  %s2600_s0 = int_to_ptr.vmem [resolvable:$true] %s2599_s0  ;;  %s2610_s30 = int_to_ptr.vmem [resolvable:$true] %s2609_s30 }
 0xe7c   :  { %s3629_s5 = scalar_lea.vmem %s2600_s0, 128  ;;  %p3634_p0 = scmp.lt.s32.totalorder %s2600_s0, %s2600_s0 }
 0xe7d   :  { %p3630_p13 = scmp.ne.s32.totalorder %s2600_s0, %s3629_s5  ;;  %p3635_p1 = scmp.lt.s32.totalorder %s3629_s5, %s3629_s5 }
 0xe7f   :  { %p3636_p2 = por %p3635_p1, %p3634_p0 }
 0xe81   :  { %p3637_p3 = pnand %p3636_p2, %p3630_p13 }
 0xe83   :  { %3640 = shalt.err (!%p3637_p3)
}
 0xe84   :  { %2602 = dma.vmem_to_hbm [thread:$0]  %s2600_s0, 128, %s4088_s16, [#allocation22]  }
 0xe85   :  { %s3649_s20 = scalar_lea.vmem %s2610_s30, 128  ;;  %p3654_p5 = scmp.lt.s32.totalorder %s2610_s30, %s2610_s30 }
 0xe86   :  { %p3650_p4 = scmp.ne.s32.totalorder %s2610_s30, %s3649_s20  ;;  %p3655_p6 = scmp.lt.s32.totalorder %s3649_s20, %s3649_s20 }
 0xe88   :  { %p3656_p7 = por %p3655_p6, %p3654_p5 }
 0xe8a   :  { %p3657_p8 = pnand %p3656_p7, %p3650_p4 }
 0xe8c   :  { %3660 = shalt.err (!%p3657_p8)
}
 0xe8d   :  { %2612 = dma.vmem_to_hbm [thread:$0]  %s2610_s30, 128, %s4089_s17, [#allocation25]   ;;  %v2837_v18 = vld [vmem:[%s4085_s13 + $0x1] ss:$2 sm:$0x3] }
 0xe8e   :  { %v2363_v2 = vrot.slane %v2837_v18, %v3881_v37  ;;  %v2367_v3 = vrot.slane %v2837_v18, %v3883_v38  ;;  %s3727_s16 = smov [#allocation20]  }
 0xe8f   :  { %s2579_s23 = sshll.u32 %s3727_s16, 4  ;;  %s2580_s23 = int_to_ptr.vmem [resolvable:$true] %s2579_s23 }
 0xe90   :  { %s3669_s17 = scalar_lea.vmem %s2580_s23, 256  ;;  %p3674_p10 = scmp.lt.s32.totalorder %s2580_s23, %s2580_s23 }
 0xe91   :  { %p3670_p9 = scmp.ne.s32.totalorder %s2580_s23, %s3669_s17  ;;  %p3675_p11 = scmp.lt.s32.totalorder %s3669_s17, %s3669_s17 }
 0xe93   :  { %p3676_p12 = por %p3675_p11, %p3674_p10 }
 0xe95   :  { %p3677_p13 = pnand %p3676_p12, %p3670_p9 }
 0xf36   :  { %v2564_v4 = vpop.f32.mrf.mxu1 }
 0xf37   :  { %v2565_v5 = vadd.f32 %v2564_v4, %v2363_v2 }
 0xf38   :  { %v2566_v52 = vpop.f32.mrf.mxu1 }
 0xf39   :  { %2571 = vst [vmem:[#allocation20] sm:$0xff] %v2565_v5  ;;  %v2567_v6 = vadd.f32 %v2566_v52, %v2367_v3 }
 0xf3a   :  { %v2568_v7 = vpop.f32.mrf.mxu1 }
 0xf3b   :  { %2572 = vst [vmem:[#allocation20 + $0x8] sm:$0xff] %v2567_v6 }
 0xf3c   :  { %v2569_v8 = vpop.f32.mrf.mxu1 }
 0xf3d   :  { %3680 = shalt.err (!%p3677_p13)
}
 0xf3e   :  { %2582 = dma.vmem_to_hbm [thread:$0]  %s2580_s23, 256, %s4086_s14, [#allocation5]  }
 0xf3f   :  { %3701 = dma.done.wait [#allocation5], 256  }
 0xf40   :  { %3702 = vsyncadd [#allocation5], 4294967040 }
 0xf41   :  { %3703 = dma.done.wait [#allocation22], 384  }
 0xf42   :  { %3704 = vsyncadd [#allocation22], 4294966912 }
 0xf43   :  { %3705 = dma.done.wait [#allocation25], 128  }
 0xf44   :  { %3706 = vsyncadd [#allocation25], 4294967168 }
 0xf45   :  { %2625 = vsyncpa [#allocation4], 1 }
 0xf46   :  { %2626 = vsyncpa [#allocation7], 1 }
 0xf47   :  { %2627 = vsyncpa [#allocation10], 1 }
 0xf48   :  { %2628 = vsyncpa [#allocation13], 1 }
 0xf49   :  { %2629 = vsyncpa [#allocation16], 1 }
 0xf4a   :  { %2630 = vsyncpa [#allocation19], 1 }
 0xf4b   :  { %2631 = vsyncpa [#allocation5], 1 }
 0xf4c   :  { %2632 = vsyncpa [#allocation22], 1 }
 0xf4d   :  { %2633 = vsyncpa [#allocation25], 1 }

</bundles_post_ra>
